<compile_context>
chip_gen: v7x
topology: tpu7x:2x2x1
jax: 0.10.0
libtpu: 0.0.40
codegen_flags: <defaults>
</compile_context>

<pallas_src>
import jax
import jax.numpy as jnp
from jax.experimental import pallas as pl
from jax.experimental.pallas import tpu as pltpu

_SQRT1_2 = 0.7071067811865476


def _gelu_exact(x):
    # PyTorch nn.GELU() default = exact erf form.  (EUP tanh variant is cheaper
    # on the VALU but changes numerics ~1e-3; owner has not relaxed tolerance.)
    return 0.5 * x * (1.0 + jax.lax.erf(x * _SQRT1_2))


def _mmoe_kernel(ev_ref,                       # (E, tb, D)   experts on leading axis
                 wgc_ref, bgc_ref,             # (D, 2E), (1, 2E)  fused 2-task gate
                 lng_ref, lnb_ref,             # (2, D), (2, D)
                 w1_ref, b1_ref,               # (2, D, H), (2, H)
                 w2_ref, b2_ref,               # (2, H, H2), (2, H2)
                 w3_ref, b3_ref,               # (2, H2), (2, 1)
                 out_ref):                     # (tb, 2)
    E = ev_ref.shape[0]
    mx_dtype = w1_ref.dtype            # bf16 on the perf path, f32 on the exact path

    # query = mean over experts.  E is the leading (untiled) axis, so this is
    # E-1 plain VPU adds of full (tb, D) tiles, accumulated in f32 regardless
    # of the streamed ev dtype.
    q = ev_ref[0].astype(jnp.float32)
    for e in range(1, E):
        q = q + ev_ref[e].astype(jnp.float32)
    query = q * (1.0 / E)                                        # (tb, D) f32

    # DenseGate for BOTH tasks in one MXU matmul: (tb, D) @ (D, 2E) -> (tb, 2E)
    gates = jnp.dot(query.astype(mx_dtype), wgc_ref[...],
                    preferred_element_type=jnp.float32) + bgc_ref[...]

    for t in range(2):                                           # static 2-task unroll
        # --- DenseGate softmax for task t (exact, EUP reciprocal + 1 Newton step) ---
        g = gates[:, t * E:(t + 1) * E]                          # (tb, E)
        g = jnp.exp(g - jnp.max(g, axis=-1, keepdims=True))
        s = jnp.sum(g, axis=-1, keepdims=True)
        r = pl.reciprocal(s, approx=True)
        r = r * (2.0 - s * r)          # Newton refinement -> well under 1e-4 tol
        w = g * r                                                # (tb, E)

        # --- Weighted fusion over experts (VPU loop over leading E axis, f32 acc) ---
        fused = w[:, 0:1] * ev_ref[0].astype(jnp.float32)
        for e in range(1, E):
            fused = fused + w[:, e:e + 1] * ev_ref[e].astype(jnp.float32)

        # --- Tower: LayerNorm -> Linear+GELU -> Linear+GELU -> Linear(1) ---
        mu = jnp.mean(fused, axis=-1, keepdims=True)
        var = jnp.mean((fused - mu) ** 2, axis=-1, keepdims=True)
        xhat = (fused - mu) * jax.lax.rsqrt(var + 1e-5)
        h = xhat * lng_ref[pl.ds(t, 1), :] + lnb_ref[pl.ds(t, 1), :]      # (tb, D) f32

        # Cast the matmul LHS to the weight dtype right before each dot (bf16 MXU
        # path, f32 accumulation); halves vreg pressure of the live tiles at tb=256.
        h1 = _gelu_exact(jnp.dot(h.astype(mx_dtype), w1_ref[t],
                                 preferred_element_type=jnp.float32)
                         + b1_ref[pl.ds(t, 1), :])               # (tb, H)
        h2 = _gelu_exact(jnp.dot(h1.astype(mx_dtype), w2_ref[t],
                                 preferred_element_type=jnp.float32)
                         + b2_ref[pl.ds(t, 1), :])               # (tb, H2)

        # Final Linear(H2, 1): VPU mul + lane reduce (avoids an N=1 matmul),
        # written straight into the task's output column.
        logit = jnp.sum(h2 * w3_ref[pl.ds(t, 1), :], axis=-1, keepdims=True) \
                + b3_ref[pl.ds(t, 1), :]                         # (tb, 1)
        out_ref[:, t:t + 1] = logit.astype(out_ref.dtype)


def _device_kind():
    try:
        return jax.devices()[0].device_kind.lower()
    except Exception:
        return ""


def _padded_bytes(shape, dtype):
    # Conservative (8,128)-tile padding estimate of one VMEM block (f32-sized
    # even for bf16 -> over-estimates, which is the safe direction for a limit).
    shape = tuple(shape)
    if len(shape) < 2:
        shape = (1,) * (2 - len(shape)) + shape
    lead = 1
    for d in shape[:-2]:
        lead *= int(d)
    r, c = int(shape[-2]), int(shape[-1])
    r_pad = -(-r // 8) * 8
    c_pad = -(-c // 128) * 128
    return lead * r_pad * c_pad * 4


def two_task_mmoe(expert_vecs, params, *, tb=None, use_bf16=True, expert_major=False):
    """expert_vecs: [B, E, D] float32 (or [E, B, D] if expert_major=True).
    Returns (logit_good [B], logit_best [B])."""
    (wg, bg, lng, lnb, w1, b1, w2, b2, w3, b3) = params
    if expert_major:
        E, B, D = expert_vecs.shape
        ev_t = expert_vecs
    else:
        B, E, D = expert_vecs.shape
        # TODO(synk): at serving batch sizes have the producer emit (E, B, D)
        # directly (pass expert_major=True) — this transpose is an extra HBM
        # round-trip of the whole activation tensor before the kernel launches.
        ev_t = jnp.transpose(expert_vecs, (1, 0, 2))             # (E, B, D)
    H, H2 = w1.shape[-1], w2.shape[-1]

    kind = _device_kind()
    newer_gen = ("v6" in kind) or ("v7" in kind)   # bf16-native VPU, 2x256^2 MXU

    # Generation-aware batch tile: one big tile so the grid collapses at small B
    # (no per-step overhead, no per-core weight re-DMA on v7x); cap at 256 on
    # v6e/v7x with bf16 operands, 128 otherwise, to stay in the 64-vreg file.
    if tb is None:
        cap = 256 if (newer_gen and use_bf16) else 128
        tb = B if B <= cap else cap
    assert B % tb == 0 and (tb == B or tb % 8 == 0), \
        "pad the batch to a multiple of the tile"  # TODO(synk): ragged-tail masking

    # bf16 for MXU-only operands (f32 accumulation via preferred_element_type).
    # expert_vecs also streamed as bf16 on v6e/v7x (native bf16 VPU); kept f32
    # on v5e to avoid bf16 unpack cost on the elementwise expert reduction.
    mx_dtype = jnp.bfloat16 if use_bf16 else jnp.float32
    if use_bf16 and newer_gen:
        ev_t = ev_t.astype(jnp.bfloat16)

    wg_cat = jnp.concatenate([wg[0], wg[1]], axis=-1).astype(mx_dtype)   # (D, 2E)
    bg_cat = jnp.concatenate([bg[0], bg[1]], axis=-1)[None, :]           # (1, 2E) f32
    w1_k = w1.astype(mx_dtype)                                           # (2, D, H)
    w2_k = w2.astype(mx_dtype)                                           # (2, H, H2)

    def const_spec(shape):
        # Constant-index weights/biases: single-buffered (no double-buffer VMEM).
        return pl.BlockSpec(shape, lambda i: (0,) * len(shape),
                            pipeline_mode=pl.Buffered(1))

    # Explicit VMEM budget (scale-up insurance, especially for v7x's 64 MiB).
    const_bytes = sum(_padded_bytes(a.shape, a.dtype) for a in
                      (wg_cat, bg_cat, lng, lnb, w1_k, b1, w2_k, b2, w3, b3))
    stream_bytes = 2 * _padded_bytes((E, tb, D), ev_t.dtype) \
                 + 2 * _padded_bytes((tb, 2), jnp.float32)
    phys_cap = (56 << 20) if ("v7" in kind) else (100 << 20)
    vmem_limit = int(min(phys_cap, max(32 << 20, 2 * (const_bytes + stream_bytes))))
    # TODO(synk): if D/H scale until one task's tower weights approach the VMEM
    # budget, split the task dim into a second grid axis (grid=(B//tb, 2)) so
    # only one tower is resident per step.

    out = pl.pallas_call(
        _mmoe_kernel,
        out_shape=jax.ShapeDtypeStruct((B, 2), jnp.float32),
        grid_spec=pltpu.PrefetchScalarGridSpec(
            num_scalar_prefetch=0,
            grid=(B // tb,),
            in_specs=[
                pl.BlockSpec((E, tb, D), lambda i: (0, i, 0)),   # streamed experts
                const_spec((D, 2 * E)), const_spec((1, 2 * E)),  # fused gate
                const_spec((2, D)), const_spec((2, D)),          # layernorm gamma/beta
                const_spec((2, D, H)), const_spec((2, H)),       # tower linear 1
                const_spec((2, H, H2)), const_spec((2, H2)),     # tower linear 2
                const_spec((2, H2)), const_spec((2, 1)),         # tower linear 3
            ],
            out_specs=pl.BlockSpec((tb, 2), lambda i: (i, 0)),
        ),
        compiler_params=pltpu.CompilerParams(
            # Batch axis only shards across v7x's 2 TCs once the grid has >1 step,
            # i.e. once streamed activation traffic dominates the per-core weight DMA.
            dimension_semantics=("parallel",),
            vmem_limit_bytes=vmem_limit),
    )(ev_t, wg_cat, bg_cat, lng, lnb, w1_k, b1, w2_k, b2, w3, b3)

    return out[:, 0], out[:, 1]


def _reference(expert_vecs, params):
    """Pure-JAX reference mirroring the PyTorch forward (f32 throughout)."""
    (wg, bg, lng, lnb, w1, b1, w2, b2, w3, b3) = params
    query = expert_vecs.mean(1)                                  # (B, D)
    logits = []
    for t in range(2):
        g = jax.nn.softmax(query @ wg[t] + bg[t], axis=-1)       # (B, E)  DenseGate
        fused = (g[:, :, None] * expert_vecs).sum(1)             # (B, D)
        mu = fused.mean(-1, keepdims=True)
        var = ((fused - mu) ** 2).mean(-1, keepdims=True)
        h = (fused - mu) / jnp.sqrt(var + 1e-5) * lng[t] + lnb[t]
        h = _gelu_exact(h @ w1[t] + b1[t])
        h = _gelu_exact(h @ w2[t] + b2[t])
        logits.append(h @ w3[t] + b3[t, 0])                      # (B,)
    return logits[0], logits[1]


def _init_params(key, D, E, H, H2):
    ks = jax.random.split(key, 8)
    scale = 0.05
    wg = jax.random.normal(ks[0], (2, D, E), jnp.float32) * scale
    bg = jax.random.normal(ks[1], (2, E), jnp.float32) * scale
    lng = 1.0 + 0.1 * jax.random.normal(ks[2], (2, D), jnp.float32)
    lnb = 0.1 * jax.random.normal(ks[3], (2, D), jnp.float32)
    w1 = jax.random.normal(ks[4], (2, D, H), jnp.float32) * scale
    b1 = jnp.zeros((2, H), jnp.float32)
    w2 = jax.random.normal(ks[5], (2, H, H2), jnp.float32) * scale
    b2 = jnp.zeros((2, H2), jnp.float32)
    w3 = jax.random.normal(ks[6], (2, H2), jnp.float32) * scale
    b3 = jax.random.normal(ks[7], (2, 1), jnp.float32) * scale
    return (wg, bg, lng, lnb, w1, b1, w2, b2, w3, b3)


if __name__ == "__main__":
    # Small shapes consistent with the module: [B, n_expert, expert_dim]
    B, E, D, H, H2 = 16, 4, 256, 128, 64
    key = jax.random.PRNGKey(0)
    k_x, k_p = jax.random.split(key)
    expert_vecs = jax.random.normal(k_x, (B, E, D), jnp.float32)
    params = _init_params(k_p, D, E, H, H2)

    ref_good, ref_best = _reference(expert_vecs, params)

    # 1) Exact-numerics path (f32 weights): must match PyTorch within 1e-4.
    g32, b32 = two_task_mmoe(expert_vecs, params, use_bf16=False)
    jax.block_until_ready((g32, b32))
    assert g32.shape == (B,) and b32.shape == (B,)
    assert jnp.allclose(g32, ref_good, atol=1e-4, rtol=1e-4)
    assert jnp.allclose(b32, ref_best, atol=1e-4, rtol=1e-4)

    # 2) Performance path (bf16 MXU weights; bf16 streamed activations on v6e/v7x):
    #    halves the dominant HBM bytes; validated at a bf16-appropriate tolerance.
    gbf, bbf = two_task_mmoe(expert_vecs, params, use_bf16=True)
    jax.block_until_ready((gbf, bbf))
    assert gbf.shape == (B,) and bbf.shape == (B,)
    assert jnp.allclose(gbf, ref_good, atol=2e-2, rtol=2e-2)
    assert jnp.allclose(bbf, ref_best, atol=2e-2, rtol=2e-2)

    print("KERNEL_OK")
</pallas_src>

<mosaic_0001>
module attributes {stable_mosaic.version = 11 : i64} {
  func.func @_mmoe_kernel(%arg0: i32, %arg1: memref<4x16x256xf32, #tpu.memory_space<vmem>>, %arg2: memref<256x8xf32, #tpu.memory_space<vmem>>, %arg3: memref<1x8xf32, #tpu.memory_space<vmem>>, %arg4: memref<2x256xf32, #tpu.memory_space<vmem>>, %arg5: memref<2x256xf32, #tpu.memory_space<vmem>>, %arg6: memref<2x256x128xf32, #tpu.memory_space<vmem>>, %arg7: memref<2x128xf32, #tpu.memory_space<vmem>>, %arg8: memref<2x128x64xf32, #tpu.memory_space<vmem>>, %arg9: memref<2x64xf32, #tpu.memory_space<vmem>>, %arg10: memref<2x64xf32, #tpu.memory_space<vmem>>, %arg11: memref<2x1xf32, #tpu.memory_space<vmem>>, %arg12: memref<16x2xf32, #tpu.memory_space<vmem>>) attributes {dimension_semantics = [#tpu.dimension_semantics<parallel>], iteration_bounds = array<i64: 1>, scalar_prefetch = 0 : i64, scratch_operands = 0 : i64, tpu.core_type = #tpu.core_type<tc>, window_params = [{transform_indices = @transform_0, window_bounds = array<i64: 4, 16, 256>}, {pipeline_mode = #tpu.pipeline_mode<synchronous>, transform_indices = @transform_1, window_bounds = array<i64: 256, 8>}, {pipeline_mode = #tpu.pipeline_mode<synchronous>, transform_indices = @transform_2, window_bounds = array<i64: 1, 8>}, {pipeline_mode = #tpu.pipeline_mode<synchronous>, transform_indices = @transform_3, window_bounds = array<i64: 2, 256>}, {pipeline_mode = #tpu.pipeline_mode<synchronous>, transform_indices = @transform_4, window_bounds = array<i64: 2, 256>}, {pipeline_mode = #tpu.pipeline_mode<synchronous>, transform_indices = @transform_5, window_bounds = array<i64: 2, 256, 128>}, {pipeline_mode = #tpu.pipeline_mode<synchronous>, transform_indices = @transform_6, window_bounds = array<i64: 2, 128>}, {pipeline_mode = #tpu.pipeline_mode<synchronous>, transform_indices = @transform_7, window_bounds = array<i64: 2, 128, 64>}, {pipeline_mode = #tpu.pipeline_mode<synchronous>, transform_indices = @transform_8, window_bounds = array<i64: 2, 64>}, {pipeline_mode = #tpu.pipeline_mode<synchronous>, transform_indices = @transform_9, window_bounds = array<i64: 2, 64>}, {pipeline_mode = #tpu.pipeline_mode<synchronous>, transform_indices = @transform_10, window_bounds = array<i64: 2, 1>}, {transform_indices = @transform_11, window_bounds = array<i64: 16, 2>}]} {
    %c0 = arith.constant 0 : index
    %c0_0 = arith.constant 0 : index
    %c0_1 = arith.constant 0 : index
    %0 = vector.load %arg1[%c0, %c0_0, %c0_1] : memref<4x16x256xf32, #tpu.memory_space<vmem>>, vector<1x16x256xf32>
    %1 = vector.shape_cast %0 : vector<1x16x256xf32> to vector<16x256xf32>
    %c1 = arith.constant 1 : index
    %c0_2 = arith.constant 0 : index
    %c0_3 = arith.constant 0 : index
    %2 = vector.load %arg1[%c1, %c0_2, %c0_3] : memref<4x16x256xf32, #tpu.memory_space<vmem>>, vector<1x16x256xf32>
    %3 = vector.shape_cast %2 : vector<1x16x256xf32> to vector<16x256xf32>
    %4 = arith.addf %1, %3 : vector<16x256xf32>
    %c2 = arith.constant 2 : index
    %c0_4 = arith.constant 0 : index
    %c0_5 = arith.constant 0 : index
    %5 = vector.load %arg1[%c2, %c0_4, %c0_5] : memref<4x16x256xf32, #tpu.memory_space<vmem>>, vector<1x16x256xf32>
    %6 = vector.shape_cast %5 : vector<1x16x256xf32> to vector<16x256xf32>
    %7 = arith.addf %4, %6 : vector<16x256xf32>
    %c3 = arith.constant 3 : index
    %c0_6 = arith.constant 0 : index
    %c0_7 = arith.constant 0 : index
    %8 = vector.load %arg1[%c3, %c0_6, %c0_7] : memref<4x16x256xf32, #tpu.memory_space<vmem>>, vector<1x16x256xf32>
    %9 = vector.shape_cast %8 : vector<1x16x256xf32> to vector<16x256xf32>
    %10 = arith.addf %7, %9 : vector<16x256xf32>
    %cst = arith.constant 2.500000e-01 : f32
    %11 = vector.broadcast %cst : f32 to vector<16x256xf32>
    %12 = arith.mulf %10, %11 : vector<16x256xf32>
    %c0_8 = arith.constant 0 : index
    %c0_9 = arith.constant 0 : index
    %13 = vector.load %arg2[%c0_8, %c0_9] : memref<256x8xf32, #tpu.memory_space<vmem>>, vector<256x8xf32>
    %cst_10 = arith.constant dense<0.000000e+00> : vector<16x8xf32>
    %14 = tpu.matmul %12, %13, %cst_10 {dimension_numbers = #tpu.dot_dimension_numbers<[1], [0], [0], [1], [0, 0, 1, 1], [], []>} : vector<16x256xf32>, vector<256x8xf32>, vector<16x8xf32> -> vector<16x8xf32>
    %c0_11 = arith.constant 0 : index
    %c0_12 = arith.constant 0 : index
    %15 = vector.load %arg3[%c0_11, %c0_12] : memref<1x8xf32, #tpu.memory_space<vmem>>, vector<1x8xf32>
    %16 = vector.broadcast %15 : vector<1x8xf32> to vector<16x8xf32>
    %17 = arith.addf %14, %16 : vector<16x8xf32>
    %18 = vector.extract_strided_slice %17 {offsets = [0, 0], sizes = [16, 4], strides = [1, 1]} : vector<16x8xf32> to vector<16x4xf32>
    %cst_13 = arith.constant dense<0xFF800000> : vector<16xf32>
    %19 = vector.multi_reduction <maximumf>, %18, %cst_13 [1] : vector<16x4xf32> to vector<16xf32>
    %20 = vector.shape_cast %19 : vector<16xf32> to vector<16x1xf32>
    %21 = vector.broadcast %20 : vector<16x1xf32> to vector<16x4xf32>
    %22 = arith.subf %18, %21 : vector<16x4xf32>
    %23 = math.exp %22 : vector<16x4xf32>
    %cst_14 = arith.constant dense<0.000000e+00> : vector<16xf32>
    %24 = vector.multi_reduction <add>, %23, %cst_14 [1] : vector<16x4xf32> to vector<16xf32>
    %25 = vector.shape_cast %24 : vector<16xf32> to vector<16x1xf32>
    %26 = tpu.reciprocal %25 {approx = true} : vector<16x1xf32> -> vector<16x1xf32>
    %27 = arith.mulf %25, %26 : vector<16x1xf32>
    %cst_15 = arith.constant 2.000000e+00 : f32
    %28 = vector.broadcast %cst_15 : f32 to vector<16x1xf32>
    %29 = arith.subf %28, %27 : vector<16x1xf32>
    %30 = arith.mulf %26, %29 : vector<16x1xf32>
    %31 = vector.broadcast %30 : vector<16x1xf32> to vector<16x4xf32>
    %32 = arith.mulf %23, %31 : vector<16x4xf32>
    %33 = vector.extract_strided_slice %32 {offsets = [0, 0], sizes = [16, 1], strides = [1, 1]} : vector<16x4xf32> to vector<16x1xf32>
    %c0_16 = arith.constant 0 : index
    %c0_17 = arith.constant 0 : index
    %c0_18 = arith.constant 0 : index
    %34 = vector.load %arg1[%c0_16, %c0_17, %c0_18] : memref<4x16x256xf32, #tpu.memory_space<vmem>>, vector<1x16x256xf32>
    %35 = vector.shape_cast %34 : vector<1x16x256xf32> to vector<16x256xf32>
    %36 = vector.broadcast %33 : vector<16x1xf32> to vector<16x256xf32>
    %37 = arith.mulf %36, %35 : vector<16x256xf32>
    %38 = vector.extract_strided_slice %32 {offsets = [0, 1], sizes = [16, 1], strides = [1, 1]} : vector<16x4xf32> to vector<16x1xf32>
    %c1_19 = arith.constant 1 : index
    %c0_20 = arith.constant 0 : index
    %c0_21 = arith.constant 0 : index
    %39 = vector.load %arg1[%c1_19, %c0_20, %c0_21] : memref<4x16x256xf32, #tpu.memory_space<vmem>>, vector<1x16x256xf32>
    %40 = vector.shape_cast %39 : vector<1x16x256xf32> to vector<16x256xf32>
    %41 = vector.broadcast %38 : vector<16x1xf32> to vector<16x256xf32>
    %42 = arith.mulf %41, %40 : vector<16x256xf32>
    %43 = arith.addf %37, %42 : vector<16x256xf32>
    %44 = vector.extract_strided_slice %32 {offsets = [0, 2], sizes = [16, 1], strides = [1, 1]} : vector<16x4xf32> to vector<16x1xf32>
    %c2_22 = arith.constant 2 : index
    %c0_23 = arith.constant 0 : index
    %c0_24 = arith.constant 0 : index
    %45 = vector.load %arg1[%c2_22, %c0_23, %c0_24] : memref<4x16x256xf32, #tpu.memory_space<vmem>>, vector<1x16x256xf32>
    %46 = vector.shape_cast %45 : vector<1x16x256xf32> to vector<16x256xf32>
    %47 = vector.broadcast %44 : vector<16x1xf32> to vector<16x256xf32>
    %48 = arith.mulf %47, %46 : vector<16x256xf32>
    %49 = arith.addf %43, %48 : vector<16x256xf32>
    %50 = vector.extract_strided_slice %32 {offsets = [0, 3], sizes = [16, 1], strides = [1, 1]} : vector<16x4xf32> to vector<16x1xf32>
    %c3_25 = arith.constant 3 : index
    %c0_26 = arith.constant 0 : index
    %c0_27 = arith.constant 0 : index
    %51 = vector.load %arg1[%c3_25, %c0_26, %c0_27] : memref<4x16x256xf32, #tpu.memory_space<vmem>>, vector<1x16x256xf32>
    %52 = vector.shape_cast %51 : vector<1x16x256xf32> to vector<16x256xf32>
    %53 = vector.broadcast %50 : vector<16x1xf32> to vector<16x256xf32>
    %54 = arith.mulf %53, %52 : vector<16x256xf32>
    %55 = arith.addf %49, %54 : vector<16x256xf32>
    %cst_28 = arith.constant dense<0.000000e+00> : vector<16xf32>
    %56 = vector.multi_reduction <add>, %55, %cst_28 [1] : vector<16x256xf32> to vector<16xf32>
    %57 = vector.shape_cast %56 : vector<16xf32> to vector<16x1xf32>
    %cst_29 = arith.constant 2.560000e+02 : f32
    %58 = vector.broadcast %cst_29 : f32 to vector<16x1xf32>
    %59 = arith.divf %57, %58 : vector<16x1xf32>
    %60 = vector.broadcast %59 : vector<16x1xf32> to vector<16x256xf32>
    %61 = arith.subf %55, %60 : vector<16x256xf32>
    %62 = arith.mulf %61, %61 : vector<16x256xf32>
    %cst_30 = arith.constant dense<0.000000e+00> : vector<16xf32>
    %63 = vector.multi_reduction <add>, %62, %cst_30 [1] : vector<16x256xf32> to vector<16xf32>
    %64 = vector.shape_cast %63 : vector<16xf32> to vector<16x1xf32>
    %cst_31 = arith.constant 2.560000e+02 : f32
    %65 = vector.broadcast %cst_31 : f32 to vector<16x1xf32>
    %66 = arith.divf %64, %65 : vector<16x1xf32>
    %67 = vector.broadcast %59 : vector<16x1xf32> to vector<16x256xf32>
    %68 = arith.subf %55, %67 : vector<16x256xf32>
    %cst_32 = arith.constant 9.99999974E-6 : f32
    %69 = vector.broadcast %cst_32 : f32 to vector<16x1xf32>
    %70 = arith.addf %66, %69 : vector<16x1xf32>
    %71 = math.rsqrt %70 : vector<16x1xf32>
    %72 = vector.broadcast %71 : vector<16x1xf32> to vector<16x256xf32>
    %73 = arith.mulf %68, %72 : vector<16x256xf32>
    %c0_33 = arith.constant 0 : index
    %c0_34 = arith.constant 0 : index
    %74 = vector.load %arg4[%c0_33, %c0_34] : memref<2x256xf32, #tpu.memory_space<vmem>>, vector<1x256xf32>
    %75 = vector.broadcast %74 : vector<1x256xf32> to vector<16x256xf32>
    %76 = arith.mulf %73, %75 : vector<16x256xf32>
    %c0_35 = arith.constant 0 : index
    %c0_36 = arith.constant 0 : index
    %77 = vector.load %arg5[%c0_35, %c0_36] : memref<2x256xf32, #tpu.memory_space<vmem>>, vector<1x256xf32>
    %78 = vector.broadcast %77 : vector<1x256xf32> to vector<16x256xf32>
    %79 = arith.addf %76, %78 : vector<16x256xf32>
    %c0_37 = arith.constant 0 : index
    %c0_38 = arith.constant 0 : index
    %c0_39 = arith.constant 0 : index
    %80 = vector.load %arg6[%c0_37, %c0_38, %c0_39] : memref<2x256x128xf32, #tpu.memory_space<vmem>>, vector<1x256x128xf32>
    %81 = vector.shape_cast %80 : vector<1x256x128xf32> to vector<256x128xf32>
    %cst_40 = arith.constant dense<0.000000e+00> : vector<16x128xf32>
    %82 = tpu.matmul %79, %81, %cst_40 {dimension_numbers = #tpu.dot_dimension_numbers<[1], [0], [0], [1], [0, 0, 1, 1], [], []>} : vector<16x256xf32>, vector<256x128xf32>, vector<16x128xf32> -> vector<16x128xf32>
    %c0_41 = arith.constant 0 : index
    %c0_42 = arith.constant 0 : index
    %83 = vector.load %arg7[%c0_41, %c0_42] : memref<2x128xf32, #tpu.memory_space<vmem>>, vector<1x128xf32>
    %84 = vector.broadcast %83 : vector<1x128xf32> to vector<16x128xf32>
    %85 = arith.addf %82, %84 : vector<16x128xf32>
    %cst_43 = arith.constant 5.000000e-01 : f32
    %86 = vector.broadcast %cst_43 : f32 to vector<16x128xf32>
    %87 = arith.mulf %86, %85 : vector<16x128xf32>
    %cst_44 = arith.constant 0.707106769 : f32
    %88 = vector.broadcast %cst_44 : f32 to vector<16x128xf32>
    %89 = arith.mulf %85, %88 : vector<16x128xf32>
    %90 = math.erf %89 : vector<16x128xf32>
    %cst_45 = arith.constant 1.000000e+00 : f32
    %91 = vector.broadcast %cst_45 : f32 to vector<16x128xf32>
    %92 = arith.addf %91, %90 : vector<16x128xf32>
    %93 = arith.mulf %87, %92 : vector<16x128xf32>
    %c0_46 = arith.constant 0 : index
    %c0_47 = arith.constant 0 : index
    %c0_48 = arith.constant 0 : index
    %94 = vector.load %arg8[%c0_46, %c0_47, %c0_48] : memref<2x128x64xf32, #tpu.memory_space<vmem>>, vector<1x128x64xf32>
    %95 = vector.shape_cast %94 : vector<1x128x64xf32> to vector<128x64xf32>
    %cst_49 = arith.constant dense<0.000000e+00> : vector<16x64xf32>
    %96 = tpu.matmul %93, %95, %cst_49 {dimension_numbers = #tpu.dot_dimension_numbers<[1], [0], [0], [1], [0, 0, 1, 1], [], []>} : vector<16x128xf32>, vector<128x64xf32>, vector<16x64xf32> -> vector<16x64xf32>
    %c0_50 = arith.constant 0 : index
    %c0_51 = arith.constant 0 : index
    %97 = vector.load %arg9[%c0_50, %c0_51] : memref<2x64xf32, #tpu.memory_space<vmem>>, vector<1x64xf32>
    %98 = vector.broadcast %97 : vector<1x64xf32> to vector<16x64xf32>
    %99 = arith.addf %96, %98 : vector<16x64xf32>
    %cst_52 = arith.constant 5.000000e-01 : f32
    %100 = vector.broadcast %cst_52 : f32 to vector<16x64xf32>
    %101 = arith.mulf %100, %99 : vector<16x64xf32>
    %cst_53 = arith.constant 0.707106769 : f32
    %102 = vector.broadcast %cst_53 : f32 to vector<16x64xf32>
    %103 = arith.mulf %99, %102 : vector<16x64xf32>
    %104 = math.erf %103 : vector<16x64xf32>
    %cst_54 = arith.constant 1.000000e+00 : f32
    %105 = vector.broadcast %cst_54 : f32 to vector<16x64xf32>
    %106 = arith.addf %105, %104 : vector<16x64xf32>
    %107 = arith.mulf %101, %106 : vector<16x64xf32>
    %c0_55 = arith.constant 0 : index
    %c0_56 = arith.constant 0 : index
    %108 = vector.load %arg10[%c0_55, %c0_56] : memref<2x64xf32, #tpu.memory_space<vmem>>, vector<1x64xf32>
    %109 = vector.broadcast %108 : vector<1x64xf32> to vector<16x64xf32>
    %110 = arith.mulf %107, %109 : vector<16x64xf32>
    %cst_57 = arith.constant dense<0.000000e+00> : vector<16xf32>
    %111 = vector.multi_reduction <add>, %110, %cst_57 [1] : vector<16x64xf32> to vector<16xf32>
    %112 = vector.shape_cast %111 : vector<16xf32> to vector<16x1xf32>
    %c0_58 = arith.constant 0 : index
    %c0_59 = arith.constant 0 : index
    %113 = vector.load %arg11[%c0_58, %c0_59] : memref<2x1xf32, #tpu.memory_space<vmem>>, vector<1x1xf32>
    %114 = vector.broadcast %113 : vector<1x1xf32> to vector<16x1xf32>
    %115 = arith.addf %112, %114 : vector<16x1xf32>
    %c0_60 = arith.constant 0 : index
    %c0_61 = arith.constant 0 : index
    %116 = vector.load %arg12[%c0_60, %c0_61] : memref<16x2xf32, #tpu.memory_space<vmem>>, vector<16x1xf32>
    tpu.vector_store %arg12[%c0_60, %c0_61], %115 {strides = array<i32>} : memref<16x2xf32, #tpu.memory_space<vmem>>, vector<16x1xf32>,
    %117 = vector.extract_strided_slice %17 {offsets = [0, 4], sizes = [16, 4], strides = [1, 1]} : vector<16x8xf32> to vector<16x4xf32>
    %cst_62 = arith.constant dense<0xFF800000> : vector<16xf32>
    %118 = vector.multi_reduction <maximumf>, %117, %cst_62 [1] : vector<16x4xf32> to vector<16xf32>
    %119 = vector.shape_cast %118 : vector<16xf32> to vector<16x1xf32>
    %120 = vector.broadcast %119 : vector<16x1xf32> to vector<16x4xf32>
    %121 = arith.subf %117, %120 : vector<16x4xf32>
    %122 = math.exp %121 : vector<16x4xf32>
    %cst_63 = arith.constant dense<0.000000e+00> : vector<16xf32>
    %123 = vector.multi_reduction <add>, %122, %cst_63 [1] : vector<16x4xf32> to vector<16xf32>
    %124 = vector.shape_cast %123 : vector<16xf32> to vector<16x1xf32>
    %125 = tpu.reciprocal %124 {approx = true} : vector<16x1xf32> -> vector<16x1xf32>
    %126 = arith.mulf %124, %125 : vector<16x1xf32>
    %cst_64 = arith.constant 2.000000e+00 : f32
    %127 = vector.broadcast %cst_64 : f32 to vector<16x1xf32>
    %128 = arith.subf %127, %126 : vector<16x1xf32>
    %129 = arith.mulf %125, %128 : vector<16x1xf32>
    %130 = vector.broadcast %129 : vector<16x1xf32> to vector<16x4xf32>
    %131 = arith.mulf %122, %130 : vector<16x4xf32>
    %132 = vector.extract_strided_slice %131 {offsets = [0, 0], sizes = [16, 1], strides = [1, 1]} : vector<16x4xf32> to vector<16x1xf32>
    %c0_65 = arith.constant 0 : index
    %c0_66 = arith.constant 0 : index
    %c0_67 = arith.constant 0 : index
    %133 = vector.load %arg1[%c0_65, %c0_66, %c0_67] : memref<4x16x256xf32, #tpu.memory_space<vmem>>, vector<1x16x256xf32>
    %134 = vector.shape_cast %133 : vector<1x16x256xf32> to vector<16x256xf32>
    %135 = vector.broadcast %132 : vector<16x1xf32> to vector<16x256xf32>
    %136 = arith.mulf %135, %134 : vector<16x256xf32>
    %137 = vector.extract_strided_slice %131 {offsets = [0, 1], sizes = [16, 1], strides = [1, 1]} : vector<16x4xf32> to vector<16x1xf32>
    %c1_68 = arith.constant 1 : index
    %c0_69 = arith.constant 0 : index
    %c0_70 = arith.constant 0 : index
    %138 = vector.load %arg1[%c1_68, %c0_69, %c0_70] : memref<4x16x256xf32, #tpu.memory_space<vmem>>, vector<1x16x256xf32>
    %139 = vector.shape_cast %138 : vector<1x16x256xf32> to vector<16x256xf32>
    %140 = vector.broadcast %137 : vector<16x1xf32> to vector<16x256xf32>
    %141 = arith.mulf %140, %139 : vector<16x256xf32>
    %142 = arith.addf %136, %141 : vector<16x256xf32>
    %143 = vector.extract_strided_slice %131 {offsets = [0, 2], sizes = [16, 1], strides = [1, 1]} : vector<16x4xf32> to vector<16x1xf32>
    %c2_71 = arith.constant 2 : index
    %c0_72 = arith.constant 0 : index
    %c0_73 = arith.constant 0 : index
    %144 = vector.load %arg1[%c2_71, %c0_72, %c0_73] : memref<4x16x256xf32, #tpu.memory_space<vmem>>, vector<1x16x256xf32>
    %145 = vector.shape_cast %144 : vector<1x16x256xf32> to vector<16x256xf32>
    %146 = vector.broadcast %143 : vector<16x1xf32> to vector<16x256xf32>
    %147 = arith.mulf %146, %145 : vector<16x256xf32>
    %148 = arith.addf %142, %147 : vector<16x256xf32>
    %149 = vector.extract_strided_slice %131 {offsets = [0, 3], sizes = [16, 1], strides = [1, 1]} : vector<16x4xf32> to vector<16x1xf32>
    %c3_74 = arith.constant 3 : index
    %c0_75 = arith.constant 0 : index
    %c0_76 = arith.constant 0 : index
    %150 = vector.load %arg1[%c3_74, %c0_75, %c0_76] : memref<4x16x256xf32, #tpu.memory_space<vmem>>, vector<1x16x256xf32>
    %151 = vector.shape_cast %150 : vector<1x16x256xf32> to vector<16x256xf32>
    %152 = vector.broadcast %149 : vector<16x1xf32> to vector<16x256xf32>
    %153 = arith.mulf %152, %151 : vector<16x256xf32>
    %154 = arith.addf %148, %153 : vector<16x256xf32>
    %cst_77 = arith.constant dense<0.000000e+00> : vector<16xf32>
    %155 = vector.multi_reduction <add>, %154, %cst_77 [1] : vector<16x256xf32> to vector<16xf32>
    %156 = vector.shape_cast %155 : vector<16xf32> to vector<16x1xf32>
    %cst_78 = arith.constant 2.560000e+02 : f32
    %157 = vector.broadcast %cst_78 : f32 to vector<16x1xf32>
    %158 = arith.divf %156, %157 : vector<16x1xf32>
    %159 = vector.broadcast %158 : vector<16x1xf32> to vector<16x256xf32>
    %160 = arith.subf %154, %159 : vector<16x256xf32>
    %161 = arith.mulf %160, %160 : vector<16x256xf32>
    %cst_79 = arith.constant dense<0.000000e+00> : vector<16xf32>
    %162 = vector.multi_reduction <add>, %161, %cst_79 [1] : vector<16x256xf32> to vector<16xf32>
    %163 = vector.shape_cast %162 : vector<16xf32> to vector<16x1xf32>
    %cst_80 = arith.constant 2.560000e+02 : f32
    %164 = vector.broadcast %cst_80 : f32 to vector<16x1xf32>
    %165 = arith.divf %163, %164 : vector<16x1xf32>
    %166 = vector.broadcast %158 : vector<16x1xf32> to vector<16x256xf32>
    %167 = arith.subf %154, %166 : vector<16x256xf32>
    %cst_81 = arith.constant 9.99999974E-6 : f32
    %168 = vector.broadcast %cst_81 : f32 to vector<16x1xf32>
    %169 = arith.addf %165, %168 : vector<16x1xf32>
    %170 = math.rsqrt %169 : vector<16x1xf32>
    %171 = vector.broadcast %170 : vector<16x1xf32> to vector<16x256xf32>
    %172 = arith.mulf %167, %171 : vector<16x256xf32>
    %c1_82 = arith.constant 1 : index
    %c0_83 = arith.constant 0 : index
    %173 = vector.load %arg4[%c1_82, %c0_83] : memref<2x256xf32, #tpu.memory_space<vmem>>, vector<1x256xf32>
    %174 = vector.broadcast %173 : vector<1x256xf32> to vector<16x256xf32>
    %175 = arith.mulf %172, %174 : vector<16x256xf32>
    %c1_84 = arith.constant 1 : index
    %c0_85 = arith.constant 0 : index
    %176 = vector.load %arg5[%c1_84, %c0_85] : memref<2x256xf32, #tpu.memory_space<vmem>>, vector<1x256xf32>
    %177 = vector.broadcast %176 : vector<1x256xf32> to vector<16x256xf32>
    %178 = arith.addf %175, %177 : vector<16x256xf32>
    %c1_86 = arith.constant 1 : index
    %c0_87 = arith.constant 0 : index
    %c0_88 = arith.constant 0 : index
    %179 = vector.load %arg6[%c1_86, %c0_87, %c0_88] : memref<2x256x128xf32, #tpu.memory_space<vmem>>, vector<1x256x128xf32>
    %180 = vector.shape_cast %179 : vector<1x256x128xf32> to vector<256x128xf32>
    %cst_89 = arith.constant dense<0.000000e+00> : vector<16x128xf32>
    %181 = tpu.matmul %178, %180, %cst_89 {dimension_numbers = #tpu.dot_dimension_numbers<[1], [0], [0], [1], [0, 0, 1, 1], [], []>} : vector<16x256xf32>, vector<256x128xf32>, vector<16x128xf32> -> vector<16x128xf32>
    %c1_90 = arith.constant 1 : index
    %c0_91 = arith.constant 0 : index
    %182 = vector.load %arg7[%c1_90, %c0_91] : memref<2x128xf32, #tpu.memory_space<vmem>>, vector<1x128xf32>
    %183 = vector.broadcast %182 : vector<1x128xf32> to vector<16x128xf32>
    %184 = arith.addf %181, %183 : vector<16x128xf32>
    %cst_92 = arith.constant 5.000000e-01 : f32
    %185 = vector.broadcast %cst_92 : f32 to vector<16x128xf32>
    %186 = arith.mulf %185, %184 : vector<16x128xf32>
    %cst_93 = arith.constant 0.707106769 : f32
    %187 = vector.broadcast %cst_93 : f32 to vector<16x128xf32>
    %188 = arith.mulf %184, %187 : vector<16x128xf32>
    %189 = math.erf %188 : vector<16x128xf32>
    %cst_94 = arith.constant 1.000000e+00 : f32
    %190 = vector.broadcast %cst_94 : f32 to vector<16x128xf32>
    %191 = arith.addf %190, %189 : vector<16x128xf32>
    %192 = arith.mulf %186, %191 : vector<16x128xf32>
    %c1_95 = arith.constant 1 : index
    %c0_96 = arith.constant 0 : index
    %c0_97 = arith.constant 0 : index
    %193 = vector.load %arg8[%c1_95, %c0_96, %c0_97] : memref<2x128x64xf32, #tpu.memory_space<vmem>>, vector<1x128x64xf32>
    %194 = vector.shape_cast %193 : vector<1x128x64xf32> to vector<128x64xf32>
    %cst_98 = arith.constant dense<0.000000e+00> : vector<16x64xf32>
    %195 = tpu.matmul %192, %194, %cst_98 {dimension_numbers = #tpu.dot_dimension_numbers<[1], [0], [0], [1], [0, 0, 1, 1], [], []>} : vector<16x128xf32>, vector<128x64xf32>, vector<16x64xf32> -> vector<16x64xf32>
    %c1_99 = arith.constant 1 : index
    %c0_100 = arith.constant 0 : index
    %196 = vector.load %arg9[%c1_99, %c0_100] : memref<2x64xf32, #tpu.memory_space<vmem>>, vector<1x64xf32>
    %197 = vector.broadcast %196 : vector<1x64xf32> to vector<16x64xf32>
    %198 = arith.addf %195, %197 : vector<16x64xf32>
    %cst_101 = arith.constant 5.000000e-01 : f32
    %199 = vector.broadcast %cst_101 : f32 to vector<16x64xf32>
    %200 = arith.mulf %199, %198 : vector<16x64xf32>
    %cst_102 = arith.constant 0.707106769 : f32
    %201 = vector.broadcast %cst_102 : f32 to vector<16x64xf32>
    %202 = arith.mulf %198, %201 : vector<16x64xf32>
    %203 = math.erf %202 : vector<16x64xf32>
    %cst_103 = arith.constant 1.000000e+00 : f32
    %204 = vector.broadcast %cst_103 : f32 to vector<16x64xf32>
    %205 = arith.addf %204, %203 : vector<16x64xf32>
    %206 = arith.mulf %200, %205 : vector<16x64xf32>
    %c1_104 = arith.constant 1 : index
    %c0_105 = arith.constant 0 : index
    %207 = vector.load %arg10[%c1_104, %c0_105] : memref<2x64xf32, #tpu.memory_space<vmem>>, vector<1x64xf32>
    %208 = vector.broadcast %207 : vector<1x64xf32> to vector<16x64xf32>
    %209 = arith.mulf %206, %208 : vector<16x64xf32>
    %cst_106 = arith.constant dense<0.000000e+00> : vector<16xf32>
    %210 = vector.multi_reduction <add>, %209, %cst_106 [1] : vector<16x64xf32> to vector<16xf32>
    %211 = vector.shape_cast %210 : vector<16xf32> to vector<16x1xf32>
    %c1_107 = arith.constant 1 : index
    %c0_108 = arith.constant 0 : index
    %212 = vector.load %arg11[%c1_107, %c0_108] : memref<2x1xf32, #tpu.memory_space<vmem>>, vector<1x1xf32>
    %213 = vector.broadcast %212 : vector<1x1xf32> to vector<16x1xf32>
    %214 = arith.addf %211, %213 : vector<16x1xf32>
    %c0_109 = arith.constant 0 : index
    %c1_110 = arith.constant 1 : index
    %215 = vector.load %arg12[%c0_109, %c1_110] : memref<16x2xf32, #tpu.memory_space<vmem>>, vector<16x1xf32>
    tpu.vector_store %arg12[%c0_109, %c1_110], %214 {strides = array<i32>} : memref<16x2xf32, #tpu.memory_space<vmem>>, vector<16x1xf32>,
    return
  }
  func.func @transform_0(%arg0: i32) -> (i32, i32, i32) {
    %c0_i32 = arith.constant 0 : i32
    %c0_i32_0 = arith.constant 0 : i32
    %c0_i32_1 = arith.constant 0 : i32
    return %c0_i32, %arg0, %c0_i32_0 : i32, i32, i32
  }
  func.func @transform_1(%arg0: i32) -> (i32, i32) {
    %c0_i32 = arith.constant 0 : i32
    %c0_i32_0 = arith.constant 0 : i32
    %c0_i32_1 = arith.constant 0 : i32
    return %c0_i32, %c0_i32_0 : i32, i32
  }
  func.func @transform_2(%arg0: i32) -> (i32, i32) {
    %c0_i32 = arith.constant 0 : i32
    %c0_i32_0 = arith.constant 0 : i32
    %c0_i32_1 = arith.constant 0 : i32
    return %c0_i32, %c0_i32_0 : i32, i32
  }
  func.func @transform_3(%arg0: i32) -> (i32, i32) {
    %c0_i32 = arith.constant 0 : i32
    %c0_i32_0 = arith.constant 0 : i32
    %c0_i32_1 = arith.constant 0 : i32
    return %c0_i32, %c0_i32_0 : i32, i32
  }
  func.func @transform_4(%arg0: i32) -> (i32, i32) {
    %c0_i32 = arith.constant 0 : i32
    %c0_i32_0 = arith.constant 0 : i32
    %c0_i32_1 = arith.constant 0 : i32
    return %c0_i32, %c0_i32_0 : i32, i32
  }
  func.func @transform_5(%arg0: i32) -> (i32, i32, i32) {
    %c0_i32 = arith.constant 0 : i32
    %c0_i32_0 = arith.constant 0 : i32
    %c0_i32_1 = arith.constant 0 : i32
    %c0_i32_2 = arith.constant 0 : i32
    return %c0_i32, %c0_i32_0, %c0_i32_1 : i32, i32, i32
  }
  func.func @transform_6(%arg0: i32) -> (i32, i32) {
    %c0_i32 = arith.constant 0 : i32
    %c0_i32_0 = arith.constant 0 : i32
    %c0_i32_1 = arith.constant 0 : i32
    return %c0_i32, %c0_i32_0 : i32, i32
  }
  func.func @transform_7(%arg0: i32) -> (i32, i32, i32) {
    %c0_i32 = arith.constant 0 : i32
    %c0_i32_0 = arith.constant 0 : i32
    %c0_i32_1 = arith.constant 0 : i32
    %c0_i32_2 = arith.constant 0 : i32
    return %c0_i32, %c0_i32_0, %c0_i32_1 : i32, i32, i32
  }
  func.func @transform_8(%arg0: i32) -> (i32, i32) {
    %c0_i32 = arith.constant 0 : i32
    %c0_i32_0 = arith.constant 0 : i32
    %c0_i32_1 = arith.constant 0 : i32
    return %c0_i32, %c0_i32_0 : i32, i32
  }
  func.func @transform_9(%arg0: i32) -> (i32, i32) {
    %c0_i32 = arith.constant 0 : i32
    %c0_i32_0 = arith.constant 0 : i32
    %c0_i32_1 = arith.constant 0 : i32
    return %c0_i32, %c0_i32_0 : i32, i32
  }
  func.func @transform_10(%arg0: i32) -> (i32, i32) {
    %c0_i32 = arith.constant 0 : i32
    %c0_i32_0 = arith.constant 0 : i32
    %c0_i32_1 = arith.constant 0 : i32
    return %c0_i32, %c0_i32_0 : i32, i32
  }
  func.func @transform_11(%arg0: i32) -> (i32, i32) {
    %c0_i32 = arith.constant 0 : i32
    %c0_i32_0 = arith.constant 0 : i32
    return %arg0, %c0_i32 : i32, i32
  }
}

</mosaic_0001>

<bundles_post_ra>
// kernel: tpu_custom_call.1
= control target key start
LH: loop header
LB: loop body
LE: loop exit
PB: predicated region body
PF: predicated region fallthrough
CT: control target
= control target key end

     0   :  { %16 = vsyncpa [#allocation3], 0  ;;  %s1588_s17 = smov [#allocation2]   ;;  %s2286_s0 = inlined_call_operand.hbm [shape: f32[4,16,256], index: 0, kind: input, shape index: {}]   ;;  %s2287_s1 = inlined_call_operand.vmem [shape: f32[256,8], index: 1, kind: input, shape index: {}]   ;;  %s2288_s2 = inlined_call_operand.vmem [shape: f32[1,8], index: 2, kind: input, shape index: {}]   ;;  %s2289_s3 = inlined_call_operand.vmem [shape: f32[2,256], index: 3, kind: input, shape index: {}]   ;;  %s2290_s4 = inlined_call_operand.vmem [shape: f32[2,256], index: 4, kind: input, shape index: {}]   ;;  %s2291_s5 = inlined_call_operand.vmem [shape: f32[2,256,128], index: 5, kind: input, shape index: {}]   ;;  %s2292_s6 = inlined_call_operand.vmem [shape: f32[2,128], index: 6, kind: input, shape index: {}]   ;;  %s2293_s7 = inlined_call_operand.vmem [shape: f32[2,128,64], index: 7, kind: input, shape index: {}]   ;;  %s2294_s8 = inlined_call_operand.vmem [shape: f32[2,64], index: 8, kind: input, shape index: {}]   ;;  %s2295_s9 = inlined_call_operand.vmem [shape: f32[2,64], index: 9, kind: input, shape index: {}]   ;;  %s2296_s10 = inlined_call_operand.vmem [shape: f32[2,1], index: 10, kind: input, shape index: {}]   ;;  %s2297_s11 = inlined_call_operand.vmem [shape: f32[16,2], index: 11, kind: output, shape index: {}]  }
   0x1   :  { %s22_s18 = sshll.u32 %s1588_s17, 4  ;;  %s1564_s21 = scalar_lea.hbm %s2286_s0, 2048  ;;  %s23_s18 = int_to_ptr.vmem [resolvable:$true] %s22_s18 }
   0x2   :  { %p1565_p0 = scmp.ne.s32.totalorder %s2286_s0, %s1564_s21  ;;  %p1568_p1 = scmp.lt.u32.totalorder %s1564_s21, %s2286_s0 }
   0x4   :  { %p1570_p2 = pnand %p1568_p1, %p1565_p0 }
   0x6   :  { %1573 = shalt.err (!%p1570_p2)
}
   0x7   :  { %s1574_s26 = scalar_lea.vmem %s23_s18, 2048  ;;  %p1579_p4 = scmp.lt.s32.totalorder %s23_s18, %s23_s18 }
   0x8   :  { %p1575_p3 = scmp.ne.s32.totalorder %s23_s18, %s1574_s26  ;;  %p1580_p5 = scmp.lt.s32.totalorder %s1574_s26, %s1574_s26 }
   0xa   :  { %p1581_p6 = por %p1580_p5, %p1579_p4 }
   0xc   :  { %p1582_p7 = pnand %p1581_p6, %p1575_p3 }
   0xe   :  { %1585 = shalt.err (!%p1582_p7)
}
   0xf   :  { %s1589_s27 = smov 256   ;;  %s1590_s28 = smov 16  }
  0x10   :  { %28 = dma.hbm_to_vmem [thread:$0]  %s2286_s0, 2048, %s23_s18, [#allocation3], %s1589_s27, %s1589_s27, %s1590_s28  }
  0x11   :  { %1586 = dma.done.wait [#allocation3], 2048  }
  0x12   :  { %1587 = vsyncadd [#allocation3], 4294965248  ;;  %v103_v0 = vld [vmem:[%s2287_s1 + $0x80] sm:$0xff]  ;;  %v104_v1 = vld [vmem:[%s2287_s1 + $0x88] sm:$0xff]  ;;  %vm609_vm0 = vcmask 64544   ;;  %vm201_vm1 = vcmask 31744  }
  0x13   :  { %v87_v2 = vld [vmem:[%s2287_s1] sm:$0xff]  ;;  %v1335_v3 = vpack.c.bf16 %v104_v1, %v103_v0  ;;  %v88_v4 = vld [vmem:[%s2287_s1 + $0x8] sm:$0xff]  ;;  %v105_v5 = vld [vmem:[%s2287_s1 + $0x90] sm:$0xff]  ;;  %vm592_vm2 = vcmask 523264   ;;  %vm606_vm3 = vcmask 7168   ;;  %vm1048_vm4 = vcmask 15368  }
  0x14   :  { %v106_v6 = vld [vmem:[%s2287_s1 + $0x98] sm:$0xff]  ;;  %v1337_v7 = vpack.c.bf16 %v88_v4, %v87_v2  ;;  %v89_v9 = vld [vmem:[%s2287_s1 + $0x10] sm:$0xff]  ;;  %v107_v11 = vld [vmem:[%s2287_s1 + $0xa0] sm:$0xff] }
  0x15   :  { %v1339_v8 = vpack.c.bf16 %v106_v6, %v105_v5  ;;  %v90_v10 = vld [vmem:[%s2287_s1 + $0x18] sm:$0xff]  ;;  %1336 = vmatprep.subr.bf16.mxu0 %v1335_v3  ;;  %v108_v12 = vld [vmem:[%s2287_s1 + $0xa8] sm:$0xff]  ;;  %v91_v15 = vld [vmem:[%s2287_s1 + $0x20] sm:$0xff] }
  0x16   :  { %1338 = vmatpush3.bf16.msra.mxu0 %v1337_v7  ;;  %v1341_v13 = vpack.c.bf16 %v90_v10, %v89_v9  ;;  %v1343_v14 = vpack.c.bf16 %v108_v12, %v107_v11  ;;  %v92_v16 = vld [vmem:[%s2287_s1 + $0x28] sm:$0xff]  ;;  %v109_v17 = vld [vmem:[%s2287_s1 + $0xb0] sm:$0xff]  ;;  %v110_v18 = vld [vmem:[%s2287_s1 + $0xb8] sm:$0xff] }
  0x17   :  { %1340 = vmatprep.subr.bf16.mxu0 %v1339_v8  ;;  %v1345_v19 = vpack.c.bf16 %v92_v16, %v91_v15  ;;  %v1347_v20 = vpack.c.bf16 %v110_v18, %v109_v17  ;;  %v93_v21 = vld [vmem:[%s2287_s1 + $0x30] sm:$0xff]  ;;  %v94_v22 = vld [vmem:[%s2287_s1 + $0x38] sm:$0xff]  ;;  %v111_v23 = vld [vmem:[%s2287_s1 + $0xc0] sm:$0xff] }
  0x18   :  { %v112_v24 = vld [vmem:[%s2287_s1 + $0xc8] sm:$0xff]  ;;  %v1349_v28 = vpack.c.bf16 %v94_v22, %v93_v21  ;;  %v95_v31 = vld [vmem:[%s2287_s1 + $0x40] sm:$0xff]  ;;  %v113_v34 = vld [vmem:[%s2287_s1 + $0xd0] sm:$0xff] }
  0x19   :  { %v1727_v25 = vld [vmem:[#allocation2 + $0x8] sm:$0xff]  ;;  %v1351_v30 = vpack.c.bf16 %v112_v24, %v111_v23  ;;  %v114_v35 = vld [vmem:[%s2287_s1 + $0xd8] sm:$0xff]  ;;  %v97_v38 = vld [vmem:[%s2287_s1 + $0x50] sm:$0xff] }
  0x1a   :  { %1342 = vmatpush3.bf16.msra.mxu0 %v1341_v13  ;;  %v1729_v26 = vld [vmem:[#allocation2 + $0x28] sm:$0xff]  ;;  %v1754_v40 = vld [vmem:[#allocation2] sm:$0xff]  ;;  %v1355_v42 = vpack.c.bf16 %v114_v35, %v113_v34  ;;  %v98_v43 = vld [vmem:[%s2287_s1 + $0x58] sm:$0xff] }
  0x1b   :  { %1344 = vmatprep.subr.bf16.mxu0 %v1343_v14  ;;  %v1731_v27 = vld [vmem:[#allocation2 + $0x48] sm:$0xff]  ;;  %v62_v29 = vadd.f32 %v1729_v26, %v1727_v25  ;;  %v1756_v41 = vld [vmem:[#allocation2 + $0x20] sm:$0xff]  ;;  %v1761_v44 = vld [vmem:[#allocation2 + $0x18] sm:$0xff]  ;;  %v1357_v50 = vpack.c.bf16 %v98_v43, %v97_v38 }
  0x1c   :  { %v96_v32 = vld [vmem:[%s2287_s1 + $0x48] sm:$0xff]  ;;  %v1763_v45 = vld [vmem:[#allocation2 + $0x38] sm:$0xff]  ;;  %v115_v46 = vld [vmem:[%s2287_s1 + $0xe0] sm:$0xff]  ;;  %v61_v49 = vadd.f32 %v1756_v41, %v1754_v40 }
  0x1d   :  { %v1741_v33 = vld [vmem:[#allocation2 + $0x68] sm:$0xff]  ;;  %v71_v36 = vadd.f32 %v1731_v27, %v62_v29  ;;  %v1353_v37 = vpack.c.bf16 %v96_v32, %v95_v31  ;;  %v1773_v51 = vld [vmem:[#allocation2 + $0x40] sm:$0xff]  ;;  %v64_v52 = vadd.f32 %v1763_v45, %v1761_v44  ;;  %v1777_v53 = vld [vmem:[#allocation2 + $0x10] sm:$0xff] }
  0x1e   :  { %1346 = vmatpush3.bf16.msra.mxu0 %v1345_v19  ;;  %v116_v47 = vld [vmem:[%s2287_s1 + $0xe8] sm:$0xff]  ;;  %v1779_v54 = vld [vmem:[#allocation2 + $0x30] sm:$0xff]  ;;  %v99_v56 = vld [vmem:[%s2287_s1 + $0x60] sm:$0xff]  ;;  %v70_v61 = vadd.f32 %v1773_v51, %v61_v49 }
  0x1f   :  { %1348 = vmatprep.subr.bf16.mxu0 %v1347_v20  ;;  %v80_v39 = vadd.f32 %v1741_v33, %v71_v36  ;;  %v1359_v55 = vpack.c.bf16 %v116_v47, %v115_v46  ;;  %v100_v57 = vld [vmem:[%s2287_s1 + $0x68] sm:$0xff]  ;;  %v1787_v58 = vld [vmem:[#allocation2 + $0x58] sm:$0xff]  ;;  %v117_v59 = vld [vmem:[%s2287_s1 + $0xf0] sm:$0xff]  ;;  %v63_v62 = vadd.f32 %v1779_v54, %v1777_v53 }
  0x20   :  { %v118_v60 = vld [vmem:[%s2287_s1 + $0xf8] sm:$0xff]  ;;  %v1361_v63 = vpack.c.bf16 %v100_v57, %v99_v56  ;;  %v1798_v0 = vld [vmem:[#allocation2 + $0x60] sm:$0xff]  ;;  %v73_v1 = vadd.f32 %v1787_v58, %v64_v52  ;;  %v1801_v2 = vld [vmem:[#allocation2 + $0x50] sm:$0xff] }
  0x21   :  { %v84_v48 = vmul.f32 0.25, %v80_v39  ;;  %v1363_v3 = vpack.c.bf16 %v118_v60, %v117_v59  ;;  %v101_v4 = vld [vmem:[%s2287_s1 + $0x70] sm:$0xff]  ;;  %v102_v5 = vld [vmem:[%s2287_s1 + $0x78] sm:$0xff]  ;;  %v79_v7 = vadd.f32 %v1798_v0, %v70_v61  ;;  %v72_v8 = vadd.f32 %v1801_v2, %v63_v62  ;;  %v1056_v17 = vld [vmem:[%s2288_s2] ss:$0 sm:$0xff]  ;;  %s1591_s2 = smov 124  }
  0x22   :  { %1350 = vmatpush3.bf16.msra.mxu0 %v1349_v28  ;;  %v1809_v6 = vld [vmem:[#allocation2 + $0x78] sm:$0xff]  ;;  %v1365_v9 = vpack.c.bf16 %v102_v5, %v101_v4  ;;  %v1814_v11 = vld [vmem:[#allocation2 + $0x70] sm:$0xff]  ;;  %v1592_v59 = vmov 1   ;;  %v1593_v60 = vmov 0  }
  0x23   :  { %1352 = vmatprep.subr.bf16.mxu0 %v1351_v30  ;;  %190 = vmatprep.mubr.f32.mxu0 %v84_v48  ;;  %v82_v10 = vadd.f32 %v1809_v6, %v73_v1  ;;  %v83_v12 = vmul.f32 0.25, %v79_v7  ;;  %v81_v13 = vadd.f32 %v1814_v11, %v72_v8 }
  0x24   :  { %1509 = vset.pattern.permute.xlu1 %v1592_v59  ;;  %1508 = vset.pattern.permute.xlu0 %v1593_v60 }
  0x25   :  { %v86_v14 = vmul.f32 0.25, %v82_v10  ;;  %v85_v15 = vmul.f32 0.25, %v81_v13 }
  0x26   :  { %1354 = vmatpush3.bf16.msra.mxu0 %v1353_v37 }
  0x27   :  { %1356 = vmatprep.subr.bf16.mxu0 %v1355_v42 }
  0x2a   :  { %1358 = vmatpush3.bf16.msra.mxu0 %v1357_v50 }
  0x2b   :  { %1360 = vmatprep.subr.bf16.mxu0 %v1359_v55 }
  0x2e   :  { %1362 = vmatpush3.bf16.msra.mxu0 %v1361_v63 }
  0x2f   :  { %1364 = vmatprep.subr.bf16.mxu0 %v1363_v3 }
  0x32   :  { %1366 = vmatpush3.bf16.msra.mxu0 %v1365_v9 }
  0x35   :  { %191 = vmatmul.mubr.f32.vlgmr.msra.gmra.mrb[0].mxu0 %v83_v12 }
  0x36   :  { %195 = vmatprep.mubr.f32.mxu0 %v86_v14  ;;  %v1594_v14 = vmov 2  }
  0x39   :  { %196 = vmatmul.mubr.f32.gmra.mrb[2].mxu0 %v85_v15  ;;  %v1595_v15 = vmov 5  }
 0x108   :  { %v1147_v16 = vpop.f32.mrb[0].mxu0 }
 0x109   :  { %v1148_v18 = vpop.f32.mrb[1].mxu0 }
 0x10a   :  { %v1149_v19 = vadd.f32 %v1148_v18, %v1147_v16  ;;  %v1596_v18 = vmov 3  }
 0x10c   :  { %v193_v20 = vadd.f32 %v1149_v19, %v1056_v17  ;;  %v1150_v21 = vpop.f32.mrb[2].mxu0 }
 0x10d   :  { %v1151_v22 = vpop.f32.mrb[3].mxu0 }
 0x10e   :  { %v1152_v23 = vadd.f32 %v1151_v22, %v1150_v21  ;;  %v610_v24 = vsel %vm609_vm0, %v193_v20, -inf  ;;  %v202_v28 = vsel %vm201_vm1, %v193_v20, -inf }
 0x10f   :  { %611 = vmax.xlane.f32.xlu0 %v610_v24  ;;  %203 = vmax.xlane.f32.xlu1 %v202_v28 }
 0x110   :  { %v198_v29 = vadd.f32 %v1152_v23, %v1056_v17 }
 0x112   :  { %v613_v30 = vsel %vm609_vm0, %v198_v29, -inf  ;;  %v205_v31 = vsel %vm201_vm1, %v198_v29, -inf }
 0x113   :  { %614 = vmax.xlane.f32.xlu0 %v613_v30  ;;  %206 = vmax.xlane.f32.xlu1 %v205_v31 }
 0x19c   :  { %v612_v32 = vpop.xlane.xlu0 %611  ;;  %v204_v42 = vpop.xlane.xlu1 %203 }
 0x19d   :  { %v616_v34 = vsub.f32 %v193_v20, %v612_v32  ;;  %v208_v49 = vsub.f32 %v193_v20, %v204_v42  ;;  %v1597_v20 = vmov 4  }
 0x19f   :  { %v618_v35 = vmul.f32 1.442695, %v616_v34  ;;  %v210_v50 = vmul.f32 1.442695, %v208_v49 }
 0x1a0   :  { %v615_v36 = vpop.xlane.xlu0 %614  ;;  %v207_v46 = vpop.xlane.xlu1 %206 }
 0x1a1   :  { %1524 = vpow2.f32 %v618_v35  ;;  %v617_v37 = vsub.f32 %v198_v29, %v615_v36  ;;  %v209_v47 = vsub.f32 %v198_v29, %v207_v46 }
 0x1a3   :  { %v620_v38 = vmul.f32 1.442695, %v617_v37  ;;  %v212_v48 = vmul.f32 1.442695, %v209_v47  ;;  %v1598_v37 = vmov 6  }
 0x1a5   :  { %1526 = vpow2.f32 %v620_v38  ;;  %v1599_v38 = vmov 7  }
 0x1a6   :  { %1528 = vpow2.f32 %v212_v48 }
 0x1a7   :  { %1530 = vpow2.f32 %v210_v50 }
 0x1ab   :  { %v1822_v39 = vpop.eup %1524 }
 0x1ac   :  { %624 = vrot.lane.b32.xlu0 %v1822_v39, %s1591_s2 }
 0x1af   :  { %v1825_v43 = vpop.eup %1526 }
 0x1b0   :  { %626 = vrot.lane.b32.xlu1 %v1825_v43, %s1591_s2  ;;  %v1529_v52 = vpop.eup %1528 }
 0x1b1   :  { %v217_v55 = vsel %vm201_vm1, %v1529_v52, 0.0  ;;  %v1531_v56 = vpop.eup %1530 }
 0x1b2   :  { %v214_v57 = vsel %vm201_vm1, %v1531_v56, 0.0 }
 0x1cb   :  { %218 = vadd.xlane.f32.xlu0 %v217_v55 }
 0x1d4   :  { %215 = vadd.xlane.f32.xlu1 %v214_v57 }
 0x21e   :  { %v625_v61 = vpop.permute.xlu0 %624 }
 0x21f   :  { %v630_v62 = vsel %vm201_vm1, %v625_v61, 0.0 }
 0x220   :  { %631 = vadd.xlane.f32.xlu0 %v630_v62 }
 0x222   :  { %v627_v63 = vpop.permute.xlu1 %626 }
 0x223   :  { %v633_v1 = vsel %vm201_vm1, %v627_v63, 0.0 }
 0x224   :  { %634 = vadd.xlane.f32.xlu1 %v633_v1 }
 0x258   :  { %v219_v4 = vpop.xlane.xlu0 %218 }
 0x261   :  { %v216_v3 = vpop.xlane.xlu1 %215 }
 0x262   :  { %1532 = vrcp.f32 %v216_v3 }
 0x263   :  { %1534 = vrcp.f32 %v219_v4 }
 0x26c   :  { %v1533_v5 = vpop.eup %1532 }
 0x26d   :  { %v222_v7 = vmul.f32 %v1533_v5, %v216_v3  ;;  %v1535_v10 = vpop.eup %1534 }
 0x26e   :  { %v223_v13 = vmul.f32 %v1535_v10, %v219_v4 }
 0x26f   :  { %v224_v8 = vsub.f32 2.0, %v222_v7 }
 0x270   :  { %v225_v16 = vsub.f32 2.0, %v223_v13 }
 0x271   :  { %v226_v9 = vmul.f32 %v1533_v5, %v224_v8 }
 0x272   :  { %v227_v17 = vmul.f32 %v1535_v10, %v225_v16 }
 0x273   :  { %v228_v12 = vmul.f32 %v1531_v56, %v226_v9 }
 0x274   :  { %v229_v19 = vmul.f32 %v1529_v52, %v227_v17 }
 0x275   :  { %245 = vperm.xlu1 %1509, %v228_v12   ;;  %232 = vperm.xlu0 %1508, %v228_v12  }
 0x279   :  { %1510 = vset.pattern.permute.xlu1 %v1594_v14  ;;  %1517 = vset.pattern.permute.xlu0 %v1595_v15 }
 0x27a   :  { %261 = vperm.xlu1 %1510, %v228_v12  }
 0x27e   :  { %1511 = vset.pattern.permute.xlu1 %v1596_v18 }
 0x27f   :  { %277 = vperm.xlu1 %1511, %v228_v12  }
 0x283   :  { %1512 = vset.pattern.permute.xlu1 %v1593_v60 }
 0x284   :  { %237 = vperm.xlu1 %1512, %v229_v19  }
 0x288   :  { %1513 = vset.pattern.permute.xlu1 %v1592_v59 }
 0x289   :  { %249 = vperm.xlu1 %1513, %v229_v19  }
 0x28d   :  { %1514 = vset.pattern.permute.xlu1 %v1594_v14 }
 0x28e   :  { %265 = vperm.xlu1 %1514, %v229_v19  }
 0x292   :  { %1515 = vset.pattern.permute.xlu1 %v1596_v18 }
 0x293   :  { %281 = vperm.xlu1 %1515, %v229_v19  }
 0x297   :  { %1516 = vset.pattern.permute.xlu1 %v1597_v20 }
 0x2ad   :  { %v632_v21 = vpop.xlane.xlu0 %631 }
 0x2ae   :  { %1536 = vrcp.f32 %v632_v21 }
 0x2b1   :  { %v635_v22 = vpop.xlane.xlu1 %634 }
 0x2b2   :  { %1538 = vrcp.f32 %v635_v22 }
 0x2b8   :  { %v1537_v23 = vpop.eup %1536 }
 0x2b9   :  { %v638_v24 = vmul.f32 %v1537_v23, %v632_v21 }
 0x2bb   :  { %v640_v28 = vsub.f32 2.0, %v638_v24 }
 0x2bc   :  { %v1539_v29 = vpop.eup %1538 }
 0x2bd   :  { %v642_v30 = vmul.f32 %v1537_v23, %v640_v28  ;;  %v639_v31 = vmul.f32 %v1539_v29, %v635_v22 }
 0x2bf   :  { %v644_v32 = vmul.f32 %v1822_v39, %v642_v30  ;;  %v641_v34 = vsub.f32 2.0, %v639_v31 }
 0x2c1   :  { %v643_v35 = vmul.f32 %v1539_v29, %v641_v34  ;;  %652 = vperm.xlu1 %1516, %v644_v32   ;;  %669 = vperm.xlu0 %1517, %v644_v32  }
 0x2c3   :  { %v645_v36 = vmul.f32 %v1825_v43, %v643_v35 }
 0x2c5   :  { %1518 = vset.pattern.permute.xlu1 %v1598_v37  ;;  %673 = vperm.xlu0 %1517, %v645_v36  }
 0x2c6   :  { %689 = vperm.xlu1 %1518, %v644_v32  }
 0x2c9   :  { %1521 = vset.pattern.permute.xlu0 %v1598_v37 }
 0x2ca   :  { %1519 = vset.pattern.permute.xlu1 %v1599_v38  ;;  %693 = vperm.xlu0 %1521, %v645_v36  }
 0x2cb   :  { %709 = vperm.xlu1 %1519, %v644_v32  }
 0x2ce   :  { %1523 = vset.pattern.permute.xlu0 %v1599_v38 }
 0x2cf   :  { %1520 = vset.pattern.permute.xlu1 %v1597_v20 }
 0x2d0   :  { %657 = vperm.xlu1 %1520, %v645_v36  }
 0x2d4   :  { %1522 = vset.pattern.permute.xlu1 %v1599_v38 }
 0x2d5   :  { %713 = vperm.xlu1 %1522, %v645_v36  }
 0x2f4   :  { %v246_v39 = vpop.permute.xlu1 %245  ;;  %v233_v42 = vpop.permute.xlu0 %232 }
 0x2f5   :  { %v240_v46 = vmul.f32 %v233_v42, %v1754_v40  ;;  %v241_v43 = vmul.f32 %v233_v42, %v1727_v25  ;;  %v252_v47 = vmul.f32 %v246_v39, %v1756_v41  ;;  %v253_v48 = vmul.f32 %v246_v39, %v1729_v26 }
 0x2f7   :  { %v256_v55 = vadd.f32 %v252_v47, %v240_v46  ;;  %v257_v56 = vadd.f32 %v253_v48, %v241_v43 }
 0x2f9   :  { %v262_v49 = vpop.permute.xlu1 %261 }
 0x2fa   :  { %v268_v50 = vmul.f32 %v262_v49, %v1773_v51  ;;  %v269_v52 = vmul.f32 %v262_v49, %v1731_v27 }
 0x2fc   :  { %v272_v59 = vadd.f32 %v268_v50, %v256_v55  ;;  %v273_v60 = vadd.f32 %v269_v52, %v257_v56 }
 0x2fe   :  { %v278_v57 = vpop.permute.xlu1 %277 }
 0x2ff   :  { %v284_v61 = vmul.f32 %v278_v57, %v1798_v0  ;;  %v285_v62 = vmul.f32 %v278_v57, %v1741_v33 }
 0x301   :  { %v1842_v63 = vadd.f32 %v284_v61, %v272_v59  ;;  %v1844_v1 = vadd.f32 %v285_v62, %v273_v60 }
 0x303   :  { %v238_v3 = vpop.permute.xlu1 %237  ;;  %v292_v4 = vadd.f32 %v1844_v1, %v1842_v63 }
 0x304   :  { %v242_v10 = vmul.f32 %v238_v3, %v1777_v53  ;;  %v243_v12 = vmul.f32 %v238_v3, %v1761_v44 }
 0x305   :  { %293 = vadd.xlane.f32.xlu1 %v292_v4  ;;  %v375_v4 = vld [vmem:[%s2291_s5 + $0x90] sm:$0xff] }
 0x308   :  { %v250_v5 = vpop.permute.xlu1 %249 }
 0x309   :  { %v254_v7 = vmul.f32 %v250_v5, %v1779_v54  ;;  %v255_v8 = vmul.f32 %v250_v5, %v1763_v45  ;;  %v376_v5 = vld [vmem:[%s2291_s5 + $0x98] sm:$0xff] }
 0x30b   :  { %v258_v15 = vadd.f32 %v254_v7, %v242_v10  ;;  %v259_v16 = vadd.f32 %v255_v8, %v243_v12  ;;  %v1371_v8 = vpack.c.bf16 %v376_v5, %v375_v4  ;;  %v360_v10 = vld [vmem:[%s2291_s5 + $0x18] sm:$0xff]  ;;  %v377_v12 = vld [vmem:[%s2291_s5 + $0xa0] sm:$0xff] }
 0x30d   :  { %v266_v9 = vpop.permute.xlu1 %265 }
 0x30e   :  { %v270_v13 = vmul.f32 %v266_v9, %v1801_v2  ;;  %v271_v14 = vmul.f32 %v266_v9, %v1787_v58  ;;  %v359_v9 = vld [vmem:[%s2291_s5 + $0x10] sm:$0xff] }
 0x310   :  { %v274_v18 = vadd.f32 %v270_v13, %v258_v15  ;;  %v275_v19 = vadd.f32 %v271_v14, %v259_v16  ;;  %v378_v13 = vld [vmem:[%s2291_s5 + $0xa8] sm:$0xff]  ;;  %v1373_v14 = vpack.c.bf16 %v360_v10, %v359_v9  ;;  %v361_v16 = vld [vmem:[%s2291_s5 + $0x20] sm:$0xff] }
 0x311   :  { %v1375_v15 = vpack.c.bf16 %v378_v13, %v377_v12 }
 0x312   :  { %v282_v17 = vpop.permute.xlu1 %281 }
 0x313   :  { %v286_v20 = vmul.f32 %v282_v17, %v1814_v11  ;;  %v287_v21 = vmul.f32 %v282_v17, %v1809_v6  ;;  %v362_v17 = vld [vmem:[%s2291_s5 + $0x28] sm:$0xff] }
 0x315   :  { %v1856_v22 = vadd.f32 %v286_v20, %v274_v18  ;;  %v1858_v23 = vadd.f32 %v287_v21, %v275_v19  ;;  %v1377_v18 = vpack.c.bf16 %v362_v17, %v361_v16 }
 0x317   :  { %v295_v24 = vadd.f32 %v1858_v23, %v1856_v22 }
 0x319   :  { %296 = vadd.xlane.f32.xlu0 %v295_v24 }
 0x340   :  { %v653_v28 = vpop.permute.xlu1 %652  ;;  %v670_v29 = vpop.permute.xlu0 %669 }
 0x341   :  { %v676_v30 = vmul.f32 %v670_v29, %v1756_v41  ;;  %v677_v31 = vmul.f32 %v670_v29, %v1729_v26  ;;  %v660_v32 = vmul.f32 %v653_v28, %v1754_v40  ;;  %v661_v34 = vmul.f32 %v653_v28, %v1727_v25 }
 0x343   :  { %v680_v38 = vadd.f32 %v676_v30, %v660_v32  ;;  %v681_v39 = vadd.f32 %v677_v31, %v661_v34 }
 0x344   :  { %v674_v42 = vpop.permute.xlu0 %673 }
 0x345   :  { %v690_v35 = vpop.permute.xlu1 %689  ;;  %v679_v50 = vmul.f32 %v674_v42, %v1763_v45 }
 0x346   :  { %v696_v36 = vmul.f32 %v690_v35, %v1773_v51  ;;  %v697_v37 = vmul.f32 %v690_v35, %v1731_v27  ;;  %v678_v27 = vmul.f32 %v674_v42, %v1779_v54 }
 0x348   :  { %v700_v43 = vadd.f32 %v696_v36, %v680_v38  ;;  %v701_v47 = vadd.f32 %v697_v37, %v681_v39  ;;  %v363_v37 = vld [vmem:[%s2291_s5 + $0x30] sm:$0xff] }
 0x349   :  { %v694_v25 = vpop.permute.xlu0 %693 }
 0x34a   :  { %v710_v46 = vpop.permute.xlu1 %709 }
 0x34b   :  { %v716_v48 = vmul.f32 %v710_v46, %v1798_v0  ;;  %v717_v41 = vmul.f32 %v710_v46, %v1741_v33  ;;  %v698_v33 = vmul.f32 %v694_v25, %v1801_v2  ;;  %v699_v0 = vmul.f32 %v694_v25, %v1787_v58  ;;  %v374_v58 = vld [vmem:[%s2291_s5 + $0x88] sm:$0xff]  ;;  %v357_v2 = vld [vmem:[%s2291_s5] sm:$0xff]  ;;  %v383_v25 = vld [vmem:[%s2291_s5 + $0xd0] sm:$0xff] }
 0x34c   :  { %v381_v46 = vld [vmem:[%s2291_s5 + $0xc0] sm:$0xff] }
 0x34d   :  { %v1870_v26 = vadd.f32 %v716_v48, %v700_v43  ;;  %v1872_v40 = vadd.f32 %v717_v41, %v701_v47  ;;  %v382_v43 = vld [vmem:[%s2291_s5 + $0xc8] sm:$0xff]  ;;  %v365_v47 = vld [vmem:[%s2291_s5 + $0x40] sm:$0xff] }
 0x34e   :  { %v1383_v48 = vpack.c.bf16 %v382_v43, %v381_v46  ;;  %v366_v41 = vld [vmem:[%s2291_s5 + $0x48] sm:$0xff]  ;;  %v1082_v43 = vld [vmem:[%s2291_s5 + $0x198] sm:$0xff] }
 0x34f   :  { %v658_v49 = vpop.permute.xlu1 %657  ;;  %v724_v51 = vadd.f32 %v1872_v40, %v1870_v26 }
 0x350   :  { %v662_v52 = vmul.f32 %v658_v49, %v1777_v53  ;;  %v663_v55 = vmul.f32 %v658_v49, %v1761_v44  ;;  %v373_v53 = vld [vmem:[%s2291_s5 + $0x80] sm:$0xff]  ;;  %v384_v49 = vld [vmem:[%s2291_s5 + $0xd8] sm:$0xff] }
 0x351   :  { %725 = vadd.xlane.f32.xlu0 %v724_v51  ;;  %v1385_v51 = vpack.c.bf16 %v366_v41, %v365_v47 }
 0x352   :  { %v682_v56 = vadd.f32 %v678_v27, %v662_v52  ;;  %v683_v57 = vadd.f32 %v679_v50, %v663_v55  ;;  %v1387_v27 = vpack.c.bf16 %v384_v49, %v383_v25  ;;  %v367_v50 = vld [vmem:[%s2291_s5 + $0x50] sm:$0xff]  ;;  %v368_v52 = vld [vmem:[%s2291_s5 + $0x58] sm:$0xff]  ;;  %v385_v55 = vld [vmem:[%s2291_s5 + $0xe0] sm:$0xff] }
 0x354   :  { %v714_v59 = vpop.permute.xlu1 %713  ;;  %v702_v60 = vadd.f32 %v698_v33, %v682_v56  ;;  %v703_v61 = vadd.f32 %v699_v0, %v683_v57  ;;  %v386_v33 = vld [vmem:[%s2291_s5 + $0xe8] sm:$0xff]  ;;  %v1389_v0 = vpack.c.bf16 %v368_v52, %v367_v50  ;;  %v369_v57 = vld [vmem:[%s2291_s5 + $0x60] sm:$0xff] }
 0x355   :  { %v718_v62 = vmul.f32 %v714_v59, %v1814_v11  ;;  %v719_v54 = vmul.f32 %v714_v59, %v1809_v6  ;;  %v1367_v6 = vpack.c.bf16 %v374_v58, %v373_v53  ;;  %v358_v11 = vld [vmem:[%s2291_s5 + $0x8] sm:$0xff]  ;;  %v1391_v56 = vpack.c.bf16 %v386_v33, %v385_v55  ;;  %v372_v53 = vld [vmem:[%s2291_s5 + $0x78] sm:$0xff]  ;;  %v1083_v50 = vld [vmem:[%s2291_s5 + $0x1a0] sm:$0xff] }
 0x356   :  { %v1369_v7 = vpack.c.bf16 %v358_v11, %v357_v2  ;;  %v370_v59 = vld [vmem:[%s2291_s5 + $0x68] sm:$0xff]  ;;  %v1079_v2 = vld [vmem:[%s2291_s5 + $0x180] sm:$0xff] }
 0x357   :  { %v1884_v3 = vadd.f32 %v718_v62, %v702_v60  ;;  %v1886_v45 = vadd.f32 %v719_v54, %v703_v61  ;;  %1368 = vmatprep.subr.bf16.mxu1 %v1367_v6  ;;  %v387_v60 = vld [vmem:[%s2291_s5 + $0xf0] sm:$0xff]  ;;  %v388_v61 = vld [vmem:[%s2291_s5 + $0xf8] sm:$0xff]  ;;  %v1393_v62 = vpack.c.bf16 %v370_v59, %v369_v57  ;;  %v1080_v6 = vld [vmem:[%s2291_s5 + $0x188] sm:$0xff] }
 0x358   :  { %1370 = vmatpush3.bf16.msra.mxu1 %v1369_v7  ;;  %v1395_v54 = vpack.c.bf16 %v388_v61, %v387_v60  ;;  %v1431_v11 = vpack.c.bf16 %v1080_v6, %v1079_v2  ;;  %v1084_v52 = vld [vmem:[%s2291_s5 + $0x1a8] sm:$0xff]  ;;  %v1085_v59 = vld [vmem:[%s2291_s5 + $0x1b0] sm:$0xff]  ;;  %v1086_v60 = vld [vmem:[%s2291_s5 + $0x1b8] sm:$0xff] }
 0x359   :  { %v727_v44 = vadd.f32 %v1886_v45, %v1884_v3  ;;  %1372 = vmatprep.subr.bf16.mxu1 %v1371_v8  ;;  %v1068_v57 = vld [vmem:[%s2291_s5 + $0x128] sm:$0xff] }
 0x35b   :  { %728 = vadd.xlane.f32.xlu1 %v727_v44  ;;  %v371_v44 = vld [vmem:[%s2291_s5 + $0x70] sm:$0xff] }
 0x35c   :  { %1374 = vmatpush3.bf16.msra.mxu1 %v1373_v14  ;;  %v1397_v58 = vpack.c.bf16 %v372_v53, %v371_v44  ;;  %v1070_v44 = vld [vmem:[%s2291_s5 + $0x138] sm:$0xff]  ;;  %v1087_v53 = vld [vmem:[%s2291_s5 + $0x1c0] sm:$0xff] }
 0x35d   :  { %1376 = vmatprep.subr.bf16.mxu1 %v1375_v15 }
 0x360   :  { %1378 = vmatpush3.bf16.msra.mxu1 %v1377_v18 }
 0x392   :  { %v294_v19 = vpop.xlane.xlu1 %293 }
 0x393   :  { %v299_v20 = vmul.f32 0.00390625, %v294_v19 }
 0x395   :  { %v1927_v21 = vsub.f32 %v1842_v63, %v299_v20  ;;  %v1930_v24 = vsub.f32 %v1844_v1, %v299_v20  ;;  %v379_v63 = vld [vmem:[%s2291_s5 + $0xb0] sm:$0xff]  ;;  %v380_v1 = vld [vmem:[%s2291_s5 + $0xb8] sm:$0xff]  ;;  %v327_v20 = vlaneseq }
 0x396   :  { %v1379_v36 = vpack.c.bf16 %v380_v1, %v379_v63 }
 0x397   :  { %v305_v28 = vmul.f32 %v1927_v21, %v1927_v21  ;;  %v306_v29 = vmul.f32 %v1930_v24, %v1930_v24 }
 0x398   :  { %1380 = vmatprep.subr.bf16.mxu1 %v1379_v36 }
 0x399   :  { %v309_v30 = vadd.f32 %v306_v29, %v305_v28  ;;  %v328_v29 = vshrl.u32 %v327_v20, 7 }
 0x39b   :  { %310 = vadd.xlane.f32.xlu0 %v309_v30  ;;  %v2032_v30 = vsub.s32 0, %v328_v29 }
 0x3a6   :  { %v297_v31 = vpop.xlane.xlu0 %296 }
 0x3a7   :  { %v300_v32 = vmul.f32 0.00390625, %v297_v31  ;;  %v341_v31 = vld [vmem:[%s2290_s4] ss:$2 sm:$0x3] }
 0x3a9   :  { %v1937_v34 = vsub.f32 %v1856_v22, %v300_v32  ;;  %v1940_v35 = vsub.f32 %v1858_v23, %v300_v32  ;;  %v364_v22 = vld [vmem:[%s2291_s5 + $0x38] sm:$0xff] }
 0x3aa   :  { %v1381_v39 = vpack.c.bf16 %v364_v22, %v363_v37  ;;  %v346_v37 = vrot.slane %v341_v31, %v2032_v30 }
 0x3ab   :  { %v307_v23 = vmul.f32 %v1937_v34, %v1937_v34  ;;  %v308_v38 = vmul.f32 %v1940_v35, %v1940_v35 }
 0x3ac   :  { %1382 = vmatpush3.bf16.msra.mxu1 %v1381_v39  ;;  %v1064_v39 = vld [vmem:[%s2291_s5 + $0x108] sm:$0xff] }
 0x3ad   :  { %v312_v42 = vadd.f32 %v308_v38, %v307_v23  ;;  %1384 = vmatprep.subr.bf16.mxu1 %v1383_v48  ;;  %v1063_v38 = vld [vmem:[%s2291_s5 + $0x100] sm:$0xff] }
 0x3ae   :  { %v1433_v41 = vpack.c.bf16 %v1064_v39, %v1063_v38 }
 0x3af   :  { %313 = vadd.xlane.f32.xlu1 %v312_v42 }
 0x3b0   :  { %1386 = vmatpush3.bf16.msra.mxu1 %v1385_v51  ;;  %v1065_v51 = vld [vmem:[%s2291_s5 + $0x110] sm:$0xff] }
 0x3b1   :  { %1388 = vmatprep.subr.bf16.mxu1 %v1387_v27  ;;  %v1066_v27 = vld [vmem:[%s2291_s5 + $0x118] sm:$0xff] }
 0x3b2   :  { %v1437_v33 = vpack.c.bf16 %v1066_v27, %v1065_v51 }
 0x3b4   :  { %1390 = vmatpush3.bf16.msra.mxu1 %v1389_v0  ;;  %v1439_v0 = vpack.c.bf16 %v1084_v52, %v1083_v50 }
 0x3b5   :  { %1392 = vmatprep.subr.bf16.mxu1 %v1391_v56  ;;  %v1067_v56 = vld [vmem:[%s2291_s5 + $0x120] sm:$0xff] }
 0x3b6   :  { %v1441_v61 = vpack.c.bf16 %v1068_v57, %v1067_v56 }
 0x3b8   :  { %1394 = vmatpush3.bf16.msra.mxu1 %v1393_v62  ;;  %v1443_v62 = vpack.c.bf16 %v1086_v60, %v1085_v59 }
 0x3b9   :  { %1396 = vmatprep.subr.bf16.mxu1 %v1395_v54  ;;  %v1069_v54 = vld [vmem:[%s2291_s5 + $0x130] sm:$0xff] }
 0x3ba   :  { %v1445_v2 = vpack.c.bf16 %v1070_v44, %v1069_v54 }
 0x3bc   :  { %1398 = vmatpush3.bf16.msra.mxu1 %v1397_v58  ;;  %v1088_v58 = vld [vmem:[%s2291_s5 + $0x1c8] sm:$0xff] }
 0x3bd   :  { %1432 = vmatprep.subr.bf16.mxu1 %v1431_v11  ;;  %v1447_v6 = vpack.c.bf16 %v1088_v58, %v1087_v53  ;;  %v1071_v11 = vld [vmem:[%s2291_s5 + $0x140] sm:$0xff]  ;;  %v484_v58 = vld [vmem:[%s2293_s7 + $0x28] sm:$0xff] }
 0x3be   :  { %v483_v53 = vld [vmem:[%s2293_s7 + $0x20] sm:$0xff] }
 0x3de   :  { %v726_v4 = vpop.xlane.xlu0 %725 }
 0x3df   :  { %v730_v5 = vmul.f32 0.00390625, %v726_v4  ;;  %v1072_v4 = vld [vmem:[%s2291_s5 + $0x148] sm:$0xff] }
 0x3e1   :  { %v2013_v7 = vsub.f32 %v1870_v26, %v730_v5  ;;  %v2016_v8 = vsub.f32 %v1872_v40, %v730_v5  ;;  %v1089_v5 = vld [vmem:[%s2291_s5 + $0x1d0] sm:$0xff] }
 0x3e3   :  { %v736_v9 = vmul.f32 %v2013_v7, %v2013_v7  ;;  %v737_v10 = vmul.f32 %v2016_v8, %v2016_v8 }
 0x3e5   :  { %v740_v12 = vadd.f32 %v737_v10, %v736_v9  ;;  %v1090_v9 = vld [vmem:[%s2291_s5 + $0x1d8] sm:$0xff] }
 0x3e7   :  { %741 = vadd.xlane.f32.xlu0 %v740_v12 }
 0x3e8   :  { %v729_v13 = vpop.xlane.xlu1 %728 }
 0x3e9   :  { %v731_v14 = vmul.f32 0.00390625, %v729_v13 }
 0x3eb   :  { %v2023_v15 = vsub.f32 %v1884_v3, %v731_v14  ;;  %v2026_v16 = vsub.f32 %v1886_v45, %v731_v14  ;;  %v2034_v3 = vsub.s32 1, %v328_v29  ;;  %v325_v45 = vld [vmem:[%s2289_s3] ss:$2 sm:$0x3]  ;;  %v1449_v14 = vpack.c.bf16 %v1072_v4, %v1071_v11  ;;  %v486_v11 = vld [vmem:[%s2293_s7 + $0x38] sm:$0xff] }
 0x3ec   :  { %v330_v32 = vrot.slane %v325_v45, %v2032_v30 }
 0x3ed   :  { %v738_v26 = vmul.f32 %v2023_v15, %v2023_v15  ;;  %v739_v40 = vmul.f32 %v2026_v16, %v2026_v16  ;;  %v334_v63 = vrot.slane %v325_v45, %v2034_v3  ;;  %v350_v22 = vrot.slane %v341_v31, %v2034_v3  ;;  %v1075_v31 = vld [vmem:[%s2291_s5 + $0x160] sm:$0xff] }
 0x3ef   :  { %v743_v17 = vadd.f32 %v739_v40, %v738_v26  ;;  %v1451_v26 = vpack.c.bf16 %v1090_v9, %v1089_v5  ;;  %v1073_v40 = vld [vmem:[%s2291_s5 + $0x150] sm:$0xff]  ;;  %v487_v5 = vld [vmem:[%s2293_s7 + $0x40] sm:$0xff]  ;;  %v488_v9 = vld [vmem:[%s2293_s7 + $0x48] sm:$0xff] }
 0x3f1   :  { %744 = vadd.xlane.f32.xlu1 %v743_v17  ;;  %v1074_v17 = vld [vmem:[%s2291_s5 + $0x158] sm:$0xff] }
 0x3f2   :  { %v1453_v29 = vpack.c.bf16 %v1074_v17, %v1073_v40  ;;  %v492_v40 = vld [vmem:[%s2293_s7 + $0x68] sm:$0xff] }
 0x428   :  { %v311_v18 = vpop.xlane.xlu0 %310 }
 0x429   :  { %v315_v19 = vmul.f32 0.00390625, %v311_v18 }
 0x42b   :  { %v317_v28 = vadd.f32 1e-05, %v315_v19 }
 0x42d   :  { %1540 = vrsqrt.f32 %v317_v28 }
 0x437   :  { %v1541_v1 = vpop.eup %1540 }
 0x438   :  { %v322_v36 = vmul.f32 %v1541_v1, %v1930_v24  ;;  %v321_v23 = vmul.f32 %v1541_v1, %v1927_v21  ;;  %v1081_v24 = vld [vmem:[%s2291_s5 + $0x190] sm:$0xff]  ;;  %v1094_v1 = vld [vmem:[%s2291_s5 + $0x1f8] sm:$0xff] }
 0x439   :  { %v1435_v49 = vpack.c.bf16 %v1082_v43, %v1081_v24 }
 0x43a   :  { %v338_v42 = vmul.f32 %v334_v63, %v322_v36  ;;  %v337_v46 = vmul.f32 %v330_v32, %v321_v23  ;;  %v1078_v23 = vld [vmem:[%s2291_s5 + $0x178] sm:$0xff] }
 0x43c   :  { %v314_v47 = vpop.xlane.xlu1 %313  ;;  %v354_v21 = vadd.f32 %v350_v22, %v338_v42  ;;  %v353_v48 = vadd.f32 %v346_v37, %v337_v46 }
 0x43d   :  { %v316_v25 = vmul.f32 0.00390625, %v314_v47  ;;  %v1061_v47 = vld [vmem:[%s2289_s3 + $0x1] ss:$2 sm:$0x3] }
 0x43e   :  { %458 = vmatprep.mubr.f32.mxu1 %v354_v21 }
 0x43f   :  { %v318_v55 = vadd.f32 1e-05, %v316_v25  ;;  %459 = vmatmul.mubr.f32.vlgmr.msra.gmra.mrb[0].mxu1 %v353_v48  ;;  %v1062_v48 = vld [vmem:[%s2290_s4 + $0x1] ss:$2 sm:$0x3]  ;;  %v766_v25 = vrot.slane %v1061_v47, %v2034_v3  ;;  %s1600_s4 = smov 1  }
 0x440   :  { %1434 = vmatpush3.bf16.msra.mxu1 %v1433_v41  ;;  %v762_v41 = vrot.slane %v1061_v47, %v2032_v30  ;;  %v779_v50 = vrot.slane %v1062_v48, %v2032_v30  ;;  %v783_v52 = vrot.slane %v1062_v48, %v2034_v3  ;;  %v480_v30 = vld [vmem:[%s2293_s7 + $0x8] sm:$0xff]  ;;  %v1098_v47 = vld [vmem:[%s2293_s7 + $0x90] sm:$0xff] }
 0x441   :  { %1542 = vrsqrt.f32 %v318_v55  ;;  %1436 = vmatprep.subr.bf16.mxu1 %v1435_v49 }
 0x444   :  { %1438 = vmatpush3.bf16.msra.mxu1 %v1437_v33 }
 0x445   :  { %1440 = vmatprep.subr.bf16.mxu1 %v1439_v0 }
 0x448   :  { %1442 = vmatpush3.bf16.msra.mxu1 %v1441_v61 }
 0x449   :  { %1444 = vmatprep.subr.bf16.mxu1 %v1443_v62 }
 0x44b   :  { %v1543_v10 = vpop.eup %1542 }
 0x44c   :  { %v324_v12 = vmul.f32 %v1543_v10, %v1940_v35  ;;  %v323_v13 = vmul.f32 %v1543_v10, %v1937_v34  ;;  %1446 = vmatpush3.bf16.msra.mxu1 %v1445_v2  ;;  %v1091_v35 = vld [vmem:[%s2291_s5 + $0x1e0] sm:$0xff]  ;;  %v1092_v34 = vld [vmem:[%s2291_s5 + $0x1e8] sm:$0xff]  ;;  %v1407_v2 = vpack.c.bf16 %v484_v58, %v483_v53  ;;  %v1415_v10 = vpack.c.bf16 %v488_v9, %v487_v5 }
 0x44d   :  { %1448 = vmatprep.subr.bf16.mxu1 %v1447_v6  ;;  %v1455_v45 = vpack.c.bf16 %v1092_v34, %v1091_v35  ;;  %v485_v6 = vld [vmem:[%s2293_s7 + $0x30] sm:$0xff]  ;;  %v1096_v34 = vld [vmem:[%s2293_s7 + $0x80] sm:$0xff] }
 0x44e   :  { %v340_v18 = vmul.f32 %v334_v63, %v324_v12  ;;  %v339_v19 = vmul.f32 %v330_v32, %v323_v13  ;;  %v1076_v32 = vld [vmem:[%s2291_s5 + $0x168] sm:$0xff]  ;;  %v1093_v63 = vld [vmem:[%s2291_s5 + $0x1f0] sm:$0xff]  ;;  %v1411_v4 = vpack.c.bf16 %v486_v11, %v485_v6  ;;  %v490_v13 = vld [vmem:[%s2293_s7 + $0x58] sm:$0xff] }
 0x44f   :  { %v1457_v36 = vpack.c.bf16 %v1076_v32, %v1075_v31  ;;  %v489_v12 = vld [vmem:[%s2293_s7 + $0x50] sm:$0xff] }
 0x450   :  { %v356_v20 = vadd.f32 %v350_v22, %v340_v18  ;;  %v355_v28 = vadd.f32 %v346_v37, %v339_v19  ;;  %1450 = vmatpush3.bf16.msra.mxu1 %v1449_v14  ;;  %v1459_v37 = vpack.c.bf16 %v1094_v1, %v1093_v63  ;;  %v1077_v22 = vld [vmem:[%s2291_s5 + $0x170] sm:$0xff]  ;;  %v1419_v14 = vpack.c.bf16 %v490_v13, %v489_v12  ;;  %v494_v19 = vld [vmem:[%s2293_s7 + $0x78] sm:$0xff] }
 0x451   :  { %1452 = vmatprep.subr.bf16.mxu1 %v1451_v26  ;;  %v1461_v38 = vpack.c.bf16 %v1078_v23, %v1077_v22  ;;  %v491_v26 = vld [vmem:[%s2293_s7 + $0x60] sm:$0xff]  ;;  %v493_v18 = vld [vmem:[%s2293_s7 + $0x70] sm:$0xff] }
 0x452   :  { %463 = vmatprep.mubr.f32.mxu1 %v356_v20  ;;  %v1423_v17 = vpack.c.bf16 %v492_v40, %v491_v26  ;;  %v1427_v35 = vpack.c.bf16 %v494_v19, %v493_v18  ;;  %v1097_v20 = vld [vmem:[%s2293_s7 + $0x88] sm:$0xff] }
 0x453   :  { %464 = vmatmul.mubr.f32.gmra.mrb[2].mxu1 %v355_v28  ;;  %v1463_v28 = vpack.c.bf16 %v1097_v20, %v1096_v34  ;;  %v1058_v34 = vld [vmem:[%s2294_s8] ss:$0 sm:$0xff] }
 0x454   :  { %1454 = vmatpush3.bf16.msra.mxu1 %v1453_v29 }
 0x455   :  { %1456 = vmatprep.subr.bf16.mxu1 %v1455_v45  ;;  %v1057_v45 = vld [vmem:[%s2292_s6] ss:$0 sm:$0xff] }
 0x458   :  { %1458 = vmatpush3.bf16.msra.mxu1 %v1457_v36 }
 0x459   :  { %1460 = vmatprep.subr.bf16.mxu1 %v1459_v37 }
 0x45c   :  { %1462 = vmatpush3.bf16.msra.mxu1 %v1461_v38 }
 0x474   :  { %v742_v39 = vpop.xlane.xlu0 %741 }
 0x475   :  { %v746_v42 = vmul.f32 0.00390625, %v742_v39 }
 0x477   :  { %v748_v46 = vadd.f32 1e-05, %v746_v42 }
 0x479   :  { %1544 = vrsqrt.f32 %v748_v46 }
 0x47e   :  { %v745_v24 = vpop.xlane.xlu1 %744 }
 0x47f   :  { %v747_v43 = vmul.f32 0.00390625, %v745_v24 }
 0x481   :  { %v749_v21 = vadd.f32 1e-05, %v747_v43 }
 0x483   :  { %v1545_v49 = vpop.eup %1544  ;;  %1546 = vrsqrt.f32 %v749_v21  ;;  %v1099_v21 = vld [vmem:[%s2293_s7 + $0x98] sm:$0xff] }
 0x484   :  { %v752_v51 = vmul.f32 %v1545_v49, %v2013_v7  ;;  %v753_v27 = vmul.f32 %v1545_v49, %v2016_v8  ;;  %v479_v8 = vld [vmem:[%s2293_s7] sm:$0xff]  ;;  %v1467_v49 = vpack.c.bf16 %v1099_v21, %v1098_v47 }
 0x485   :  { %v1399_v3 = vpack.c.bf16 %v480_v30, %v479_v8  ;;  %v1110_v8 = vld [vmem:[%s2293_s7 + $0xf0] sm:$0xff]  ;;  %v1111_v30 = vld [vmem:[%s2293_s7 + $0xf8] sm:$0xff] }
 0x486   :  { %v769_v55 = vmul.f32 %v762_v41, %v752_v51  ;;  %v770_v33 = vmul.f32 %v766_v25, %v753_v27  ;;  %v1100_v51 = vld [vmem:[%s2293_s7 + $0xa0] sm:$0xff]  ;;  %v1101_v27 = vld [vmem:[%s2293_s7 + $0xa8] sm:$0xff] }
 0x487   :  { %1400 = vmatprep.subr.bf16.mxu0 %v1399_v3 }
 0x488   :  { %v786_v0 = vadd.f32 %v779_v50, %v769_v55  ;;  %v787_v56 = vadd.f32 %v783_v52, %v770_v33  ;;  %1402 = vmatpush3.bf16.msra.mxu0 %v1399_v3  ;;  %v1103_v55 = vld [vmem:[%s2293_s7 + $0xb8] sm:$0xff] }
 0x48a   :  { %892 = vmatprep.mubr.f32.mxu1 %v787_v56  ;;  %v1105_v56 = vld [vmem:[%s2293_s7 + $0xc8] sm:$0xff] }
 0x48b   :  { %893 = vmatmul.mubr.f32.vlgmr.msra.gmra.mrb[4].mxu1 %v786_v0  ;;  %v1104_v0 = vld [vmem:[%s2293_s7 + $0xc0] sm:$0xff] }
 0x48d   :  { %v1547_v57 = vpop.eup %1546 }
 0x48e   :  { %v755_v59 = vmul.f32 %v1547_v57, %v2026_v16  ;;  %v754_v60 = vmul.f32 %v1547_v57, %v2023_v15  ;;  %v481_v16 = vld [vmem:[%s2293_s7 + $0x10] sm:$0xff]  ;;  %v482_v15 = vld [vmem:[%s2293_s7 + $0x18] sm:$0xff]  ;;  %v1479_v57 = vpack.c.bf16 %v1105_v56, %v1104_v0 }
 0x48f   :  { %v1403_v44 = vpack.c.bf16 %v482_v15, %v481_v16  ;;  %v1491_v16 = vpack.c.bf16 %v1111_v30, %v1110_v8  ;;  %v1095_v15 = vld [vmem:[%s2292_s6 + $0x1] ss:$0 sm:$0xff] }
 0x490   :  { %v772_v61 = vmul.f32 %v766_v25, %v755_v59  ;;  %v771_v62 = vmul.f32 %v762_v41, %v754_v60  ;;  %v1106_v59 = vld [vmem:[%s2293_s7 + $0xd0] sm:$0xff]  ;;  %v1107_v60 = vld [vmem:[%s2293_s7 + $0xd8] sm:$0xff] }
 0x491   :  { %1404 = vmatprep.subr.bf16.mxu0 %v1403_v44 }
 0x492   :  { %v789_v7 = vadd.f32 %v783_v52, %v772_v61  ;;  %v788_v54 = vadd.f32 %v779_v50, %v771_v62  ;;  %1406 = vmatpush3.bf16.msra.mxu0 %v1403_v44  ;;  %v1471_v50 = vpack.c.bf16 %v1101_v27, %v1100_v51  ;;  %v1102_v52 = vld [vmem:[%s2293_s7 + $0xb0] sm:$0xff]  ;;  %v1483_v61 = vpack.c.bf16 %v1107_v60, %v1106_v59  ;;  %v1108_v62 = vld [vmem:[%s2293_s7 + $0xe0] sm:$0xff] }
 0x493   :  { %1408 = vmatprep.subr.bf16.mxu0 %v1407_v2  ;;  %v1475_v33 = vpack.c.bf16 %v1103_v55, %v1102_v52  ;;  %v1059_v52 = vld [vmem:[%s2295_s9] ss:$0 sm:$0xff] }
 0x494   :  { %897 = vmatprep.mubr.f32.mxu1 %v789_v7  ;;  %v1109_v7 = vld [vmem:[%s2293_s7 + $0xe8] sm:$0xff] }
 0x495   :  { %898 = vmatmul.mubr.f32.gmra.mrb[6].mxu1 %v788_v54  ;;  %v1487_v54 = vpack.c.bf16 %v1109_v7, %v1108_v62  ;;  %v1114_v7 = vld [vmem:[%s2296_s10 + $0x1] ss:$0 sm:$0xff] }
 0x496   :  { %1410 = vmatpush3.bf16.msra.mxu0 %v1407_v2 }
 0x497   :  { %1412 = vmatprep.subr.bf16.mxu0 %v1411_v4 }
 0x49a   :  { %1414 = vmatpush3.bf16.msra.mxu0 %v1411_v4 }
 0x49b   :  { %1416 = vmatprep.subr.bf16.mxu0 %v1415_v10 }
 0x49e   :  { %1418 = vmatpush3.bf16.msra.mxu0 %v1415_v10 }
 0x49f   :  { %1420 = vmatprep.subr.bf16.mxu0 %v1419_v14 }
 0x4a2   :  { %1422 = vmatpush3.bf16.msra.mxu0 %v1419_v14 }
 0x4a3   :  { %1424 = vmatprep.subr.bf16.mxu0 %v1423_v17 }
 0x4a6   :  { %1426 = vmatpush3.bf16.msra.mxu0 %v1423_v17 }
 0x4a7   :  { %1428 = vmatprep.subr.bf16.mxu0 %v1427_v35 }
 0x4aa   :  { %1430 = vmatpush3.bf16.msra.mxu0 %v1427_v35 }
 0x4ab   :  { %1464 = vmatprep.subr.bf16.mxu0 %v1463_v28 }
 0x512   :  { %v1185_v29 = vpop.f32.mrb[0].mxu1 }
 0x513   :  { %v1186_v31 = vpop.f32.mrb[1].mxu1 }
 0x514   :  { %v1187_v32 = vadd.f32 %v1186_v31, %v1185_v29  ;;  %v1112_v31 = vld [vmem:[%s2294_s8 + $0x1] ss:$0 sm:$0xff] }
 0x516   :  { %v461_v63 = vadd.f32 %v1187_v32, %v1057_v45 }
 0x518   :  { %v471_v1 = vmul.f32 0.70710677, %v461_v63  ;;  %v469_v37 = vmul.f32 0.5, %v461_v63 }
 0x51a   :  { %1548 = verf.f32 %v471_v1 }
 0x524   :  { %v1549_v36 = vpop.eup %1548 }
 0x525   :  { %v475_v22 = vadd.f32 1.0, %v1549_v36 }
 0x526   :  { %v1188_v23 = vpop.f32.mrb[2].mxu1 }
 0x527   :  { %v1189_v38 = vpop.f32.mrb[3].mxu1  ;;  %v477_v39 = vmul.f32 %v475_v22, %v469_v37 }
 0x528   :  { %v1190_v42 = vadd.f32 %v1189_v38, %v1188_v23 }
 0x529   :  { %1297 = vmatprep.mubr.f32.mxu0 %v477_v39 }
 0x52a   :  { %v466_v46 = vadd.f32 %v1190_v42, %v1057_v45 }
 0x52c   :  { %v472_v24 = vmul.f32 0.70710677, %v466_v46  ;;  %v470_v48 = vmul.f32 0.5, %v466_v46 }
 0x52e   :  { %1550 = verf.f32 %v472_v24 }
 0x538   :  { %v1551_v43 = vpop.eup %1550 }
 0x539   :  { %v476_v41 = vadd.f32 1.0, %v1551_v43 }
 0x53b   :  { %v478_v25 = vmul.f32 %v476_v41, %v470_v48 }
 0x53d   :  { %1298 = vmatmul.mubr.f32.vlgmr.msra.gmra.mrb[4].mxu0 %v478_v25 }
 0x53e   :  { %1466 = vmatpush3.bf16.msra.mxu0 %v1463_v28 }
 0x53f   :  { %1468 = vmatprep.subr.bf16.mxu0 %v1467_v49 }
 0x542   :  { %1470 = vmatpush3.bf16.msra.mxu0 %v1467_v49  ;;  %v1113_v49 = vld [vmem:[%s2295_s9 + $0x1] ss:$0 sm:$0xff] }
 0x543   :  { %1472 = vmatprep.subr.bf16.mxu0 %v1471_v50 }
 0x546   :  { %1474 = vmatpush3.bf16.msra.mxu0 %v1471_v50 }
 0x547   :  { %1476 = vmatprep.subr.bf16.mxu0 %v1475_v33 }
 0x54a   :  { %1478 = vmatpush3.bf16.msra.mxu0 %v1475_v33 }
 0x54b   :  { %1480 = vmatprep.subr.bf16.mxu0 %v1479_v57 }
 0x54e   :  { %1482 = vmatpush3.bf16.msra.mxu0 %v1479_v57 }
 0x54f   :  { %1484 = vmatprep.subr.bf16.mxu0 %v1483_v61 }
 0x552   :  { %1486 = vmatpush3.bf16.msra.mxu0 %v1483_v61 }
 0x553   :  { %1488 = vmatprep.subr.bf16.mxu0 %v1487_v54 }
 0x556   :  { %1490 = vmatpush3.bf16.msra.mxu0 %v1487_v54 }
 0x557   :  { %1492 = vmatprep.subr.bf16.mxu0 %v1491_v16 }
 0x55a   :  { %1494 = vmatpush3.bf16.msra.mxu0 %v1491_v16 }
 0x55e   :  { %v1241_v3 = vpop.f32.mrb[4].mxu1 }
 0x55f   :  { %v1242_v44 = vpop.f32.mrb[5].mxu1 }
 0x560   :  { %v1243_v53 = vadd.f32 %v1242_v44, %v1241_v3  ;;  %v1060_v3 = vld [vmem:[%s2296_s10] ss:$0 sm:$0xff] }
 0x562   :  { %v895_v58 = vadd.f32 %v1243_v53, %v1095_v15 }
 0x564   :  { %v905_v2 = vmul.f32 0.70710677, %v895_v58  ;;  %v903_v12 = vmul.f32 0.5, %v895_v58 }
 0x566   :  { %1552 = verf.f32 %v905_v2 }
 0x568   :  { %v1244_v6 = vpop.f32.mrb[6].mxu1 }
 0x569   :  { %v1245_v11 = vpop.f32.mrb[7].mxu1 }
 0x56a   :  { %v1246_v4 = vadd.f32 %v1245_v11, %v1244_v6 }
 0x56c   :  { %v900_v5 = vadd.f32 %v1246_v4, %v1095_v15 }
 0x56e   :  { %v906_v9 = vmul.f32 0.70710677, %v900_v5  ;;  %v904_v40 = vmul.f32 0.5, %v900_v5 }
 0x570   :  { %v1553_v10 = vpop.eup %1552  ;;  %1554 = verf.f32 %v906_v9 }
 0x571   :  { %v909_v13 = vadd.f32 1.0, %v1553_v10 }
 0x573   :  { %v911_v14 = vmul.f32 %v909_v13, %v903_v12 }
 0x575   :  { %1332 = vmatprep.mubr.f32.mxu0 %v911_v14 }
 0x57a   :  { %v1555_v26 = vpop.eup %1554 }
 0x57b   :  { %v910_v17 = vadd.f32 1.0, %v1555_v26 }
 0x57d   :  { %v912_v18 = vmul.f32 %v910_v17, %v904_v40 }
 0x57f   :  { %1333 = vmatmul.mubr.f32.vlgmr.msra.gmra.mrb[6].mxu0 %v912_v18 }
 0x610   :  { %v1299_v19 = vpop.f32.mrb[4].mxu0 }
 0x611   :  { %v566_v35 = vpop.f32.mrb[5].mxu0  ;;  %v572_v20 = vadd.f32 %v1299_v19, %v1058_v34 }
 0x612   :  { %v567_v28 = vadd.f32 %v1058_v34, %v566_v35 }
 0x613   :  { %v578_v29 = vmul.f32 0.70710677, %v572_v20  ;;  %v576_v43 = vmul.f32 0.5, %v572_v20 }
 0x614   :  { %v577_v45 = vmul.f32 0.70710677, %v567_v28  ;;  %v575_v48 = vmul.f32 0.5, %v567_v28 }
 0x615   :  { %1556 = verf.f32 %v578_v29 }
 0x616   :  { %1558 = verf.f32 %v577_v45 }
 0x61f   :  { %v1557_v23 = vpop.eup %1556 }
 0x620   :  { %v1559_v38 = vpop.eup %1558  ;;  %v582_v39 = vadd.f32 1.0, %v1557_v23 }
 0x621   :  { %v581_v46 = vadd.f32 1.0, %v1559_v38 }
 0x622   :  { %v584_v27 = vmul.f32 %v582_v39, %v576_v43 }
 0x623   :  { %v583_v55 = vmul.f32 %v581_v46, %v575_v48 }
 0x624   :  { %v591_v57 = vmul.f32 %v1059_v52, %v584_v27 }
 0x625   :  { %v590_v60 = vmul.f32 %v1059_v52, %v583_v55 }
 0x626   :  { %v596_v61 = vsel %vm592_vm2, %v591_v57, 0.0 }
 0x627   :  { %v593_v62 = vsel %vm592_vm2, %v590_v60, 0.0 }
 0x652   :  { %v1334_v32 = vpop.f32.mrb[6].mxu0 }
 0x653   :  { %v1007_v63 = vadd.f32 %v1334_v32, %v1112_v31  ;;  %v1001_v1 = vpop.f32.mrb[7].mxu0 }
 0x654   :  { %v1002_v36 = vadd.f32 %v1112_v31, %v1001_v1 }
 0x655   :  { %v1013_v37 = vmul.f32 0.70710677, %v1007_v63  ;;  %v1011_v47 = vmul.f32 0.5, %v1007_v63 }
 0x656   :  { %v1012_v22 = vmul.f32 0.70710677, %v1002_v36  ;;  %v1010_v41 = vmul.f32 0.5, %v1002_v36 }
 0x657   :  { %1560 = verf.f32 %v1013_v37 }
 0x658   :  { %1562 = verf.f32 %v1012_v22 }
 0x661   :  { %v1561_v42 = vpop.eup %1560 }
 0x662   :  { %v1563_v24 = vpop.eup %1562  ;;  %v1017_v21 = vadd.f32 1.0, %v1561_v42 }
 0x663   :  { %v1016_v25 = vadd.f32 1.0, %v1563_v24 }
 0x664   :  { %v1019_v51 = vmul.f32 %v1017_v21, %v1011_v47 }
 0x665   :  { %v1018_v50 = vmul.f32 %v1016_v25, %v1010_v41 }
 0x666   :  { %v1026_v33 = vmul.f32 %v1113_v49, %v1019_v51 }
 0x667   :  { %v1025_v0 = vmul.f32 %v1113_v49, %v1018_v50 }
 0x668   :  { %v1030_v56 = vsel %vm592_vm2, %v1026_v33, 0.0 }
 0x669   :  { %1031 = vadd.xlane.f32.xlu1 %v1030_v56  ;;  %v1027_v59 = vsel %vm592_vm2, %v1025_v0, 0.0 }
 0x66a   :  { %1028 = vadd.xlane.f32.xlu0 %v1027_v59 }
 0x66d   :  { %597 = vadd.xlane.f32.xlu1 %v596_v61 }
 0x66e   :  { %594 = vadd.xlane.f32.xlu0 %v593_v62 }
 0x6f6   :  { %v1032_v54 = vpop.xlane.xlu1 %1031 }
 0x6f7   :  { %v1039_v8 = vadd.f32 %v1114_v7, %v1032_v54  ;;  %v1029_v30 = vpop.xlane.xlu0 %1028 }
 0x6f8   :  { %v1038_v16 = vadd.f32 %v1114_v7, %v1029_v30 }
 0x6f9   :  { %1044 = vrot.lane.b32.xlu1 %v1039_v8, %s1600_s4 }
 0x6fa   :  { %v598_v15 = vpop.xlane.xlu1 %597  ;;  %1042 = vrot.lane.b32.xlu0 %v1038_v16, %s1600_s4 }
 0x6fb   :  { %v605_v44 = vadd.f32 %v1060_v3, %v598_v15  ;;  %v595_v53 = vpop.xlane.xlu0 %594 }
 0x6fc   :  { %v604_v58 = vadd.f32 %v1060_v3, %v595_v53 }
 0x6fd   :  { %608 = vst.msk [vmem:[%s2297_s11 + $0x8] sm:$0xff] %vm606_vm3, %v605_v44 }
 0x6fe   :  { %607 = vst.msk [vmem:[%s2297_s11] sm:$0xff] %vm606_vm3, %v604_v58 }
 0x76b   :  { %v1045_v2 = vpop.permute.xlu1 %1044 }
 0x76c   :  { %1050 = vst.msk [vmem:[%s2297_s11 + $0x8] sm:$0xff] %vm1048_vm4, %v1045_v2  ;;  %v1043_v6 = vpop.permute.xlu0 %1042 }
 0x76d   :  { %1049 = vst.msk [vmem:[%s2297_s11] sm:$0xff] %vm1048_vm4, %v1043_v6 }
 0x76e   :  { %1055 = vsyncpa [#allocation3], 1 }

</bundles_post_ra>
